<compile_context>
chip_gen: v7x
topology: tpu7x:2x2x1
jax: 0.10.0
libtpu: 0.0.40
codegen_flags: <defaults>
</compile_context>

<pallas_src>
import functools

import jax
import jax.numpy as jnp
import numpy as np
from jax.experimental import pallas as pl
from jax.experimental.pallas import tpu as pltpu

EPS = 1e-5


def _tap_masks(H, W, C):
    """Host-side precompute of the 9 'SAME'-padding validity masks, already
    broadcast over channels: (9, C, H*W) f32, tap order t = (dy+1)*3+(dx+1)."""
    p = np.arange(H * W)
    hh, ww = p // W, p % W
    rows = []
    for dy in (-1, 0, 1):
        for dx in (-1, 0, 1):
            valid = ((hh + dy >= 0) & (hh + dy < H) &
                     (ww + dx >= 0) & (ww + dx < W))
            rows.append(valid.astype(np.float32))
    m = np.stack(rows, axis=0)[:, None, :]                      # (9, 1, P)
    return jnp.asarray(np.broadcast_to(m, (9, C, H * W)).copy())


def resnet_block_kernel(x_ref, w_ref, bn_ref, m_ref, out_ref, *, W):
    """x_ref/out_ref: (N, C, P) f32, P = H*W (lane-dense per image).
    w_ref: (2, 9, Cout, Cin) f32.  bn_ref: (C, 4) = [g1, b1, g2, b2] columns.
    m_ref: (9, C, P) f32 tap-validity masks."""
    N, C, P = x_ref.shape

    x = x_ref[...]                       # (N, C, P)
    w = w_ref[...]                       # (2, 9, C, C)
    bn = bn_ref[...]                     # (C, 4)
    masks = m_ref[...]                   # (9, C, P)

    # (roll amount, mask, is_center) per tap -- rolls are lane-axis XLU ops.
    taps = []
    t = 0
    for dy in (-1, 0, 1):
        for dx in (-1, 0, 1):
            taps.append(((-(dy * W + dx)) % P, masks[t], dy == 0 and dx == 0))
            t += 1

    def conv3x3(xn, conv_idx):
        """3x3 'SAME' conv on one (C, P) image slab: 9 per-tap matmuls
        accumulated in f32 (no patch-matrix concat)."""
        acc = None
        for ti, (ra, m, is_center) in enumerate(taps):
            s = xn if ra == 0 else pltpu.roll(xn, ra, axis=1)
            tap_in = s if is_center else s * m
            contrib = jnp.dot(w[conv_idx, ti], tap_in,
                              preferred_element_type=jnp.float32)
            acc = contrib if acc is None else acc + contrib
        return acc                                              # (C, P)

    def batchnorm(ys, g_col, b_col, relu):
        """Training-mode BN over (N, H, W): two-pass (y - mean)^2 variance."""
        inv_n = 1.0 / (len(ys) * P)
        mean = sum(jnp.sum(y, axis=-1, keepdims=True) for y in ys) * inv_n
        var = sum(jnp.sum((y - mean) * (y - mean), axis=-1, keepdims=True)
                  for y in ys) * inv_n
        g = bn[:, g_col:g_col + 1]                              # (C, 1)
        b = bn[:, b_col:b_col + 1]
        scale = jax.lax.rsqrt(var + EPS) * g                    # EUP rsqrt
        shift = b - mean * scale
        outs = [y * scale + shift for y in ys]
        if relu:
            outs = [jnp.maximum(o, 0.0) for o in outs]
        return outs

    # conv01: conv3x3 -> BN -> ReLU   (conv bias cancelled by BN mean)
    y1 = [conv3x3(x[n], 0) for n in range(N)]
    a1 = batchnorm(y1, 0, 1, relu=True)

    # conv02: conv3x3 -> BN
    y2 = [conv3x3(a1[n], 1) for n in range(N)]
    z2 = batchnorm(y2, 2, 3, relu=False)

    # residual add (un-transformed input) + final ReLU
    for n in range(N):
        out_ref[n] = jnp.maximum(z2[n] + x[n], 0.0)


@jax.jit
def resnet_block(x_nchw, params):
    """ResnetBlock forward (stride=1, Cin==Cout). x: (N,C,H,W) f32 -> same."""
    N, C, H, W = x_nchw.shape
    P = H * W

    # Layout plumbing: all free reshapes / tiny param packing, no transposes
    # of the activations.
    x_slab = x_nchw.astype(jnp.float32).reshape(N, C, P)
    w_pack = jnp.stack([
        jnp.transpose(params["w1"], (2, 3, 0, 1)).reshape(9, C, C),
        jnp.transpose(params["w2"], (2, 3, 0, 1)).reshape(9, C, C),
    ]).astype(jnp.float32)                                       # (2,9,C,C)
    bn_pack = jnp.stack([params["g1"], params["beta1"],
                         params["g2"], params["beta2"]],
                        axis=1).astype(jnp.float32)              # (C, 4)
    masks = _tap_masks(H, W, C)                                  # (9, C, P)

    # Tight VMEM budget, capped at device capacity (v7x = 64 MiB physical).
    footprint = 4 * (2 * N * C * P + 2 * 9 * C * C + 4 * C + 9 * C * P)
    try:
        cap = int(pltpu.get_tpu_info().vmem_capacity_bytes)
    except Exception:
        cap = 64 * 1024 * 1024
    vmem_limit = int(min(max(4 * footprint, 8 * 1024 * 1024),
                         cap - (8 << 20)))

    vmem = pl.BlockSpec(memory_space=pltpu.MemorySpace.VMEM)
    out_slab = pl.pallas_call(
        functools.partial(resnet_block_kernel, W=W),
        out_shape=jax.ShapeDtypeStruct((N, C, P), jnp.float32),
        in_specs=[vmem, vmem, vmem, vmem],
        out_specs=vmem,
        input_output_aliases={0: 0},
        compiler_params=pltpu.CompilerParams(vmem_limit_bytes=vmem_limit),
    )(x_slab, w_pack, bn_pack, masks)

    return out_slab.reshape(N, C, H, W)


# ----------------------------- pure-JAX reference ---------------------------
def _ref_forward(x, params):
    """NCHW reference matching the PyTorch module (training-mode BN, biased
    variance, eps=1e-5, conv bias=True)."""
    def conv(inp, w, b):
        y = jax.lax.conv_general_dilated(
            inp, w, window_strides=(1, 1), padding=((1, 1), (1, 1)),
            dimension_numbers=("NCHW", "OIHW", "NCHW"),
            precision=jax.lax.Precision.HIGHEST)
        return y + b.reshape(1, -1, 1, 1)

    def bn(y, g, beta):
        mean = jnp.mean(y, axis=(0, 2, 3), keepdims=True)
        var = jnp.mean((y - mean) ** 2, axis=(0, 2, 3), keepdims=True)
        return ((y - mean) * jax.lax.rsqrt(var + EPS) * g.reshape(1, -1, 1, 1)
                + beta.reshape(1, -1, 1, 1))

    y = jnp.maximum(bn(conv(x, params["w1"], params["b1"]),
                       params["g1"], params["beta1"]), 0.0)
    z = bn(conv(y, params["w2"], params["b2"]),
           params["g2"], params["beta2"])
    return jnp.maximum(z + x, 0.0)


if __name__ == "__main__":
    # identity_down_sample=None  =>  stride=1 and in_channels == out_channels
    N, C, H, W = 2, 4, 16, 16

    key = jax.random.PRNGKey(0)
    ks = jax.random.split(key, 9)
    x = jax.random.normal(ks[0], (N, C, H, W), jnp.float32)

    def conv_w(k):   # PyTorch OIHW layout
        return 0.1 * jax.random.normal(k, (C, C, 3, 3), jnp.float32)

    def vec(k, scale=0.1, offset=0.0):
        return offset + scale * jax.random.normal(k, (C,), jnp.float32)

    params = {
        "w1": conv_w(ks[1]), "b1": vec(ks[2]),
        "g1": vec(ks[3], offset=1.0), "beta1": vec(ks[4]),
        "w2": conv_w(ks[5]), "b2": vec(ks[6]),
        "g2": vec(ks[7], offset=1.0), "beta2": vec(ks[8]),
    }

    out = jax.block_until_ready(resnet_block(x, params))
    ref = jax.block_until_ready(_ref_forward(x, params))

    # The reference applies the conv biases; the kernel drops them (training-
    # mode BN cancels them exactly), so this also checks that claim.
    np.testing.assert_allclose(np.asarray(out), np.asarray(ref),
                               atol=2e-3, rtol=2e-3)
    assert out.shape == (N, C, H, W) and out.dtype == jnp.float32
    print("KERNEL_OK")
</pallas_src>

<mosaic_0001>
module attributes {stable_mosaic.version = 11 : i64} {
  func.func @resnet_block_kernel(%arg0: memref<2x4x256xf32, #tpu.memory_space<vmem>>, %arg1: memref<2x9x4x4xf32, #tpu.memory_space<vmem>>, %arg2: memref<4x4xf32, #tpu.memory_space<vmem>>, %arg3: memref<9x4x256xf32, #tpu.memory_space<vmem>>, %arg4: memref<2x4x256xf32, #tpu.memory_space<vmem>>) attributes {dimension_semantics = [], scalar_prefetch = 0 : i64, scratch_operands = 0 : i64, tpu.core_type = #tpu.core_type<tc>} {
    %c0 = arith.constant 0 : index
    %c0_0 = arith.constant 0 : index
    %c0_1 = arith.constant 0 : index
    %0 = vector.load %arg0[%c0, %c0_0, %c0_1] : memref<2x4x256xf32, #tpu.memory_space<vmem>>, vector<2x4x256xf32>
    %c0_2 = arith.constant 0 : index
    %c0_3 = arith.constant 0 : index
    %c0_4 = arith.constant 0 : index
    %c0_5 = arith.constant 0 : index
    %1 = vector.load %arg1[%c0_2, %c0_3, %c0_4, %c0_5] : memref<2x9x4x4xf32, #tpu.memory_space<vmem>>, vector<2x9x4x4xf32>
    %c0_6 = arith.constant 0 : index
    %c0_7 = arith.constant 0 : index
    %2 = vector.load %arg2[%c0_6, %c0_7] : memref<4x4xf32, #tpu.memory_space<vmem>>, vector<4x4xf32>
    %c0_8 = arith.constant 0 : index
    %c0_9 = arith.constant 0 : index
    %c0_10 = arith.constant 0 : index
    %3 = vector.load %arg3[%c0_8, %c0_9, %c0_10] : memref<9x4x256xf32, #tpu.memory_space<vmem>>, vector<9x4x256xf32>
    %4 = vector.extract_strided_slice %3 {offsets = [0, 0, 0], sizes = [1, 4, 256], strides = [1, 1, 1]} : vector<9x4x256xf32> to vector<1x4x256xf32>
    %5 = vector.shape_cast %4 : vector<1x4x256xf32> to vector<4x256xf32>
    %6 = vector.extract_strided_slice %3 {offsets = [1, 0, 0], sizes = [1, 4, 256], strides = [1, 1, 1]} : vector<9x4x256xf32> to vector<1x4x256xf32>
    %7 = vector.shape_cast %6 : vector<1x4x256xf32> to vector<4x256xf32>
    %8 = vector.extract_strided_slice %3 {offsets = [2, 0, 0], sizes = [1, 4, 256], strides = [1, 1, 1]} : vector<9x4x256xf32> to vector<1x4x256xf32>
    %9 = vector.shape_cast %8 : vector<1x4x256xf32> to vector<4x256xf32>
    %10 = vector.extract_strided_slice %3 {offsets = [3, 0, 0], sizes = [1, 4, 256], strides = [1, 1, 1]} : vector<9x4x256xf32> to vector<1x4x256xf32>
    %11 = vector.shape_cast %10 : vector<1x4x256xf32> to vector<4x256xf32>
    %12 = vector.extract_strided_slice %3 {offsets = [5, 0, 0], sizes = [1, 4, 256], strides = [1, 1, 1]} : vector<9x4x256xf32> to vector<1x4x256xf32>
    %13 = vector.shape_cast %12 : vector<1x4x256xf32> to vector<4x256xf32>
    %14 = vector.extract_strided_slice %3 {offsets = [6, 0, 0], sizes = [1, 4, 256], strides = [1, 1, 1]} : vector<9x4x256xf32> to vector<1x4x256xf32>
    %15 = vector.shape_cast %14 : vector<1x4x256xf32> to vector<4x256xf32>
    %16 = vector.extract_strided_slice %3 {offsets = [7, 0, 0], sizes = [1, 4, 256], strides = [1, 1, 1]} : vector<9x4x256xf32> to vector<1x4x256xf32>
    %17 = vector.shape_cast %16 : vector<1x4x256xf32> to vector<4x256xf32>
    %18 = vector.extract_strided_slice %3 {offsets = [8, 0, 0], sizes = [1, 4, 256], strides = [1, 1, 1]} : vector<9x4x256xf32> to vector<1x4x256xf32>
    %19 = vector.shape_cast %18 : vector<1x4x256xf32> to vector<4x256xf32>
    %20 = vector.extract_strided_slice %0 {offsets = [0, 0, 0], sizes = [1, 4, 256], strides = [1, 1, 1]} : vector<2x4x256xf32> to vector<1x4x256xf32>
    %21 = vector.shape_cast %20 : vector<1x4x256xf32> to vector<4x256xf32>
    %c17_i32 = arith.constant 17 : i32
    %22 = tpu.dynamic_rotate %21 by %c17_i32 dim 1 : vector<4x256xf32>, i32 -> vector<4x256xf32>
    %23 = arith.mulf %22, %5 : vector<4x256xf32>
    %24 = vector.extract_strided_slice %1 {offsets = [0, 0, 0, 0], sizes = [1, 1, 4, 4], strides = [1, 1, 1, 1]} : vector<2x9x4x4xf32> to vector<1x1x4x4xf32>
    %25 = vector.shape_cast %24 : vector<1x1x4x4xf32> to vector<4x4xf32>
    %cst = arith.constant dense<0.000000e+00> : vector<4x256xf32>
    %26 = tpu.matmul %25, %23, %cst {dimension_numbers = #tpu.dot_dimension_numbers<[1], [0], [0], [1], [0, 0, 1, 1], [], []>} : vector<4x4xf32>, vector<4x256xf32>, vector<4x256xf32> -> vector<4x256xf32>
    %c16_i32 = arith.constant 16 : i32
    %27 = tpu.dynamic_rotate %21 by %c16_i32 dim 1 : vector<4x256xf32>, i32 -> vector<4x256xf32>
    %28 = arith.mulf %27, %7 : vector<4x256xf32>
    %29 = vector.extract_strided_slice %1 {offsets = [0, 1, 0, 0], sizes = [1, 1, 4, 4], strides = [1, 1, 1, 1]} : vector<2x9x4x4xf32> to vector<1x1x4x4xf32>
    %30 = vector.shape_cast %29 : vector<1x1x4x4xf32> to vector<4x4xf32>
    %cst_11 = arith.constant dense<0.000000e+00> : vector<4x256xf32>
    %31 = tpu.matmul %30, %28, %cst_11 {dimension_numbers = #tpu.dot_dimension_numbers<[1], [0], [0], [1], [0, 0, 1, 1], [], []>} : vector<4x4xf32>, vector<4x256xf32>, vector<4x256xf32> -> vector<4x256xf32>
    %32 = arith.addf %26, %31 : vector<4x256xf32>
    %c15_i32 = arith.constant 15 : i32
    %33 = tpu.dynamic_rotate %21 by %c15_i32 dim 1 : vector<4x256xf32>, i32 -> vector<4x256xf32>
    %34 = arith.mulf %33, %9 : vector<4x256xf32>
    %35 = vector.extract_strided_slice %1 {offsets = [0, 2, 0, 0], sizes = [1, 1, 4, 4], strides = [1, 1, 1, 1]} : vector<2x9x4x4xf32> to vector<1x1x4x4xf32>
    %36 = vector.shape_cast %35 : vector<1x1x4x4xf32> to vector<4x4xf32>
    %cst_12 = arith.constant dense<0.000000e+00> : vector<4x256xf32>
    %37 = tpu.matmul %36, %34, %cst_12 {dimension_numbers = #tpu.dot_dimension_numbers<[1], [0], [0], [1], [0, 0, 1, 1], [], []>} : vector<4x4xf32>, vector<4x256xf32>, vector<4x256xf32> -> vector<4x256xf32>
    %38 = arith.addf %32, %37 : vector<4x256xf32>
    %c1_i32 = arith.constant 1 : i32
    %39 = tpu.dynamic_rotate %21 by %c1_i32 dim 1 : vector<4x256xf32>, i32 -> vector<4x256xf32>
    %40 = arith.mulf %39, %11 : vector<4x256xf32>
    %41 = vector.extract_strided_slice %1 {offsets = [0, 3, 0, 0], sizes = [1, 1, 4, 4], strides = [1, 1, 1, 1]} : vector<2x9x4x4xf32> to vector<1x1x4x4xf32>
    %42 = vector.shape_cast %41 : vector<1x1x4x4xf32> to vector<4x4xf32>
    %cst_13 = arith.constant dense<0.000000e+00> : vector<4x256xf32>
    %43 = tpu.matmul %42, %40, %cst_13 {dimension_numbers = #tpu.dot_dimension_numbers<[1], [0], [0], [1], [0, 0, 1, 1], [], []>} : vector<4x4xf32>, vector<4x256xf32>, vector<4x256xf32> -> vector<4x256xf32>
    %44 = arith.addf %38, %43 : vector<4x256xf32>
    %45 = vector.extract_strided_slice %1 {offsets = [0, 4, 0, 0], sizes = [1, 1, 4, 4], strides = [1, 1, 1, 1]} : vector<2x9x4x4xf32> to vector<1x1x4x4xf32>
    %46 = vector.shape_cast %45 : vector<1x1x4x4xf32> to vector<4x4xf32>
    %cst_14 = arith.constant dense<0.000000e+00> : vector<4x256xf32>
    %47 = tpu.matmul %46, %21, %cst_14 {dimension_numbers = #tpu.dot_dimension_numbers<[1], [0], [0], [1], [0, 0, 1, 1], [], []>} : vector<4x4xf32>, vector<4x256xf32>, vector<4x256xf32> -> vector<4x256xf32>
    %48 = arith.addf %44, %47 : vector<4x256xf32>
    %c255_i32 = arith.constant 255 : i32
    %49 = tpu.dynamic_rotate %21 by %c255_i32 dim 1 : vector<4x256xf32>, i32 -> vector<4x256xf32>
    %50 = arith.mulf %49, %13 : vector<4x256xf32>
    %51 = vector.extract_strided_slice %1 {offsets = [0, 5, 0, 0], sizes = [1, 1, 4, 4], strides = [1, 1, 1, 1]} : vector<2x9x4x4xf32> to vector<1x1x4x4xf32>
    %52 = vector.shape_cast %51 : vector<1x1x4x4xf32> to vector<4x4xf32>
    %cst_15 = arith.constant dense<0.000000e+00> : vector<4x256xf32>
    %53 = tpu.matmul %52, %50, %cst_15 {dimension_numbers = #tpu.dot_dimension_numbers<[1], [0], [0], [1], [0, 0, 1, 1], [], []>} : vector<4x4xf32>, vector<4x256xf32>, vector<4x256xf32> -> vector<4x256xf32>
    %54 = arith.addf %48, %53 : vector<4x256xf32>
    %c241_i32 = arith.constant 241 : i32
    %55 = tpu.dynamic_rotate %21 by %c241_i32 dim 1 : vector<4x256xf32>, i32 -> vector<4x256xf32>
    %56 = arith.mulf %55, %15 : vector<4x256xf32>
    %57 = vector.extract_strided_slice %1 {offsets = [0, 6, 0, 0], sizes = [1, 1, 4, 4], strides = [1, 1, 1, 1]} : vector<2x9x4x4xf32> to vector<1x1x4x4xf32>
    %58 = vector.shape_cast %57 : vector<1x1x4x4xf32> to vector<4x4xf32>
    %cst_16 = arith.constant dense<0.000000e+00> : vector<4x256xf32>
    %59 = tpu.matmul %58, %56, %cst_16 {dimension_numbers = #tpu.dot_dimension_numbers<[1], [0], [0], [1], [0, 0, 1, 1], [], []>} : vector<4x4xf32>, vector<4x256xf32>, vector<4x256xf32> -> vector<4x256xf32>
    %60 = arith.addf %54, %59 : vector<4x256xf32>
    %c240_i32 = arith.constant 240 : i32
    %61 = tpu.dynamic_rotate %21 by %c240_i32 dim 1 : vector<4x256xf32>, i32 -> vector<4x256xf32>
    %62 = arith.mulf %61, %17 : vector<4x256xf32>
    %63 = vector.extract_strided_slice %1 {offsets = [0, 7, 0, 0], sizes = [1, 1, 4, 4], strides = [1, 1, 1, 1]} : vector<2x9x4x4xf32> to vector<1x1x4x4xf32>
    %64 = vector.shape_cast %63 : vector<1x1x4x4xf32> to vector<4x4xf32>
    %cst_17 = arith.constant dense<0.000000e+00> : vector<4x256xf32>
    %65 = tpu.matmul %64, %62, %cst_17 {dimension_numbers = #tpu.dot_dimension_numbers<[1], [0], [0], [1], [0, 0, 1, 1], [], []>} : vector<4x4xf32>, vector<4x256xf32>, vector<4x256xf32> -> vector<4x256xf32>
    %66 = arith.addf %60, %65 : vector<4x256xf32>
    %c239_i32 = arith.constant 239 : i32
    %67 = tpu.dynamic_rotate %21 by %c239_i32 dim 1 : vector<4x256xf32>, i32 -> vector<4x256xf32>
    %68 = arith.mulf %67, %19 : vector<4x256xf32>
    %69 = vector.extract_strided_slice %1 {offsets = [0, 8, 0, 0], sizes = [1, 1, 4, 4], strides = [1, 1, 1, 1]} : vector<2x9x4x4xf32> to vector<1x1x4x4xf32>
    %70 = vector.shape_cast %69 : vector<1x1x4x4xf32> to vector<4x4xf32>
    %cst_18 = arith.constant dense<0.000000e+00> : vector<4x256xf32>
    %71 = tpu.matmul %70, %68, %cst_18 {dimension_numbers = #tpu.dot_dimension_numbers<[1], [0], [0], [1], [0, 0, 1, 1], [], []>} : vector<4x4xf32>, vector<4x256xf32>, vector<4x256xf32> -> vector<4x256xf32>
    %72 = arith.addf %66, %71 : vector<4x256xf32>
    %73 = vector.extract_strided_slice %0 {offsets = [1, 0, 0], sizes = [1, 4, 256], strides = [1, 1, 1]} : vector<2x4x256xf32> to vector<1x4x256xf32>
    %74 = vector.shape_cast %73 : vector<1x4x256xf32> to vector<4x256xf32>
    %c17_i32_19 = arith.constant 17 : i32
    %75 = tpu.dynamic_rotate %74 by %c17_i32_19 dim 1 : vector<4x256xf32>, i32 -> vector<4x256xf32>
    %76 = arith.mulf %75, %5 : vector<4x256xf32>
    %77 = vector.extract_strided_slice %1 {offsets = [0, 0, 0, 0], sizes = [1, 1, 4, 4], strides = [1, 1, 1, 1]} : vector<2x9x4x4xf32> to vector<1x1x4x4xf32>
    %78 = vector.shape_cast %77 : vector<1x1x4x4xf32> to vector<4x4xf32>
    %cst_20 = arith.constant dense<0.000000e+00> : vector<4x256xf32>
    %79 = tpu.matmul %78, %76, %cst_20 {dimension_numbers = #tpu.dot_dimension_numbers<[1], [0], [0], [1], [0, 0, 1, 1], [], []>} : vector<4x4xf32>, vector<4x256xf32>, vector<4x256xf32> -> vector<4x256xf32>
    %c16_i32_21 = arith.constant 16 : i32
    %80 = tpu.dynamic_rotate %74 by %c16_i32_21 dim 1 : vector<4x256xf32>, i32 -> vector<4x256xf32>
    %81 = arith.mulf %80, %7 : vector<4x256xf32>
    %82 = vector.extract_strided_slice %1 {offsets = [0, 1, 0, 0], sizes = [1, 1, 4, 4], strides = [1, 1, 1, 1]} : vector<2x9x4x4xf32> to vector<1x1x4x4xf32>
    %83 = vector.shape_cast %82 : vector<1x1x4x4xf32> to vector<4x4xf32>
    %cst_22 = arith.constant dense<0.000000e+00> : vector<4x256xf32>
    %84 = tpu.matmul %83, %81, %cst_22 {dimension_numbers = #tpu.dot_dimension_numbers<[1], [0], [0], [1], [0, 0, 1, 1], [], []>} : vector<4x4xf32>, vector<4x256xf32>, vector<4x256xf32> -> vector<4x256xf32>
    %85 = arith.addf %79, %84 : vector<4x256xf32>
    %c15_i32_23 = arith.constant 15 : i32
    %86 = tpu.dynamic_rotate %74 by %c15_i32_23 dim 1 : vector<4x256xf32>, i32 -> vector<4x256xf32>
    %87 = arith.mulf %86, %9 : vector<4x256xf32>
    %88 = vector.extract_strided_slice %1 {offsets = [0, 2, 0, 0], sizes = [1, 1, 4, 4], strides = [1, 1, 1, 1]} : vector<2x9x4x4xf32> to vector<1x1x4x4xf32>
    %89 = vector.shape_cast %88 : vector<1x1x4x4xf32> to vector<4x4xf32>
    %cst_24 = arith.constant dense<0.000000e+00> : vector<4x256xf32>
    %90 = tpu.matmul %89, %87, %cst_24 {dimension_numbers = #tpu.dot_dimension_numbers<[1], [0], [0], [1], [0, 0, 1, 1], [], []>} : vector<4x4xf32>, vector<4x256xf32>, vector<4x256xf32> -> vector<4x256xf32>
    %91 = arith.addf %85, %90 : vector<4x256xf32>
    %c1_i32_25 = arith.constant 1 : i32
    %92 = tpu.dynamic_rotate %74 by %c1_i32_25 dim 1 : vector<4x256xf32>, i32 -> vector<4x256xf32>
    %93 = arith.mulf %92, %11 : vector<4x256xf32>
    %94 = vector.extract_strided_slice %1 {offsets = [0, 3, 0, 0], sizes = [1, 1, 4, 4], strides = [1, 1, 1, 1]} : vector<2x9x4x4xf32> to vector<1x1x4x4xf32>
    %95 = vector.shape_cast %94 : vector<1x1x4x4xf32> to vector<4x4xf32>
    %cst_26 = arith.constant dense<0.000000e+00> : vector<4x256xf32>
    %96 = tpu.matmul %95, %93, %cst_26 {dimension_numbers = #tpu.dot_dimension_numbers<[1], [0], [0], [1], [0, 0, 1, 1], [], []>} : vector<4x4xf32>, vector<4x256xf32>, vector<4x256xf32> -> vector<4x256xf32>
    %97 = arith.addf %91, %96 : vector<4x256xf32>
    %98 = vector.extract_strided_slice %1 {offsets = [0, 4, 0, 0], sizes = [1, 1, 4, 4], strides = [1, 1, 1, 1]} : vector<2x9x4x4xf32> to vector<1x1x4x4xf32>
    %99 = vector.shape_cast %98 : vector<1x1x4x4xf32> to vector<4x4xf32>
    %cst_27 = arith.constant dense<0.000000e+00> : vector<4x256xf32>
    %100 = tpu.matmul %99, %74, %cst_27 {dimension_numbers = #tpu.dot_dimension_numbers<[1], [0], [0], [1], [0, 0, 1, 1], [], []>} : vector<4x4xf32>, vector<4x256xf32>, vector<4x256xf32> -> vector<4x256xf32>
    %101 = arith.addf %97, %100 : vector<4x256xf32>
    %c255_i32_28 = arith.constant 255 : i32
    %102 = tpu.dynamic_rotate %74 by %c255_i32_28 dim 1 : vector<4x256xf32>, i32 -> vector<4x256xf32>
    %103 = arith.mulf %102, %13 : vector<4x256xf32>
    %104 = vector.extract_strided_slice %1 {offsets = [0, 5, 0, 0], sizes = [1, 1, 4, 4], strides = [1, 1, 1, 1]} : vector<2x9x4x4xf32> to vector<1x1x4x4xf32>
    %105 = vector.shape_cast %104 : vector<1x1x4x4xf32> to vector<4x4xf32>
    %cst_29 = arith.constant dense<0.000000e+00> : vector<4x256xf32>
    %106 = tpu.matmul %105, %103, %cst_29 {dimension_numbers = #tpu.dot_dimension_numbers<[1], [0], [0], [1], [0, 0, 1, 1], [], []>} : vector<4x4xf32>, vector<4x256xf32>, vector<4x256xf32> -> vector<4x256xf32>
    %107 = arith.addf %101, %106 : vector<4x256xf32>
    %c241_i32_30 = arith.constant 241 : i32
    %108 = tpu.dynamic_rotate %74 by %c241_i32_30 dim 1 : vector<4x256xf32>, i32 -> vector<4x256xf32>
    %109 = arith.mulf %108, %15 : vector<4x256xf32>
    %110 = vector.extract_strided_slice %1 {offsets = [0, 6, 0, 0], sizes = [1, 1, 4, 4], strides = [1, 1, 1, 1]} : vector<2x9x4x4xf32> to vector<1x1x4x4xf32>
    %111 = vector.shape_cast %110 : vector<1x1x4x4xf32> to vector<4x4xf32>
    %cst_31 = arith.constant dense<0.000000e+00> : vector<4x256xf32>
    %112 = tpu.matmul %111, %109, %cst_31 {dimension_numbers = #tpu.dot_dimension_numbers<[1], [0], [0], [1], [0, 0, 1, 1], [], []>} : vector<4x4xf32>, vector<4x256xf32>, vector<4x256xf32> -> vector<4x256xf32>
    %113 = arith.addf %107, %112 : vector<4x256xf32>
    %c240_i32_32 = arith.constant 240 : i32
    %114 = tpu.dynamic_rotate %74 by %c240_i32_32 dim 1 : vector<4x256xf32>, i32 -> vector<4x256xf32>
    %115 = arith.mulf %114, %17 : vector<4x256xf32>
    %116 = vector.extract_strided_slice %1 {offsets = [0, 7, 0, 0], sizes = [1, 1, 4, 4], strides = [1, 1, 1, 1]} : vector<2x9x4x4xf32> to vector<1x1x4x4xf32>
    %117 = vector.shape_cast %116 : vector<1x1x4x4xf32> to vector<4x4xf32>
    %cst_33 = arith.constant dense<0.000000e+00> : vector<4x256xf32>
    %118 = tpu.matmul %117, %115, %cst_33 {dimension_numbers = #tpu.dot_dimension_numbers<[1], [0], [0], [1], [0, 0, 1, 1], [], []>} : vector<4x4xf32>, vector<4x256xf32>, vector<4x256xf32> -> vector<4x256xf32>
    %119 = arith.addf %113, %118 : vector<4x256xf32>
    %c239_i32_34 = arith.constant 239 : i32
    %120 = tpu.dynamic_rotate %74 by %c239_i32_34 dim 1 : vector<4x256xf32>, i32 -> vector<4x256xf32>
    %121 = arith.mulf %120, %19 : vector<4x256xf32>
    %122 = vector.extract_strided_slice %1 {offsets = [0, 8, 0, 0], sizes = [1, 1, 4, 4], strides = [1, 1, 1, 1]} : vector<2x9x4x4xf32> to vector<1x1x4x4xf32>
    %123 = vector.shape_cast %122 : vector<1x1x4x4xf32> to vector<4x4xf32>
    %cst_35 = arith.constant dense<0.000000e+00> : vector<4x256xf32>
    %124 = tpu.matmul %123, %121, %cst_35 {dimension_numbers = #tpu.dot_dimension_numbers<[1], [0], [0], [1], [0, 0, 1, 1], [], []>} : vector<4x4xf32>, vector<4x256xf32>, vector<4x256xf32> -> vector<4x256xf32>
    %125 = arith.addf %119, %124 : vector<4x256xf32>
    %cst_36 = arith.constant dense<0.000000e+00> : vector<4xf32>
    %126 = vector.multi_reduction <add>, %72, %cst_36 [1] : vector<4x256xf32> to vector<4xf32>
    %127 = vector.shape_cast %126 : vector<4xf32> to vector<4x1xf32>
    %cst_37 = arith.constant 0.000000e+00 : f32
    %128 = vector.broadcast %cst_37 : f32 to vector<4x1xf32>
    %129 = arith.addf %128, %127 : vector<4x1xf32>
    %cst_38 = arith.constant dense<0.000000e+00> : vector<4xf32>
    %130 = vector.multi_reduction <add>, %125, %cst_38 [1] : vector<4x256xf32> to vector<4xf32>
    %131 = vector.shape_cast %130 : vector<4xf32> to vector<4x1xf32>
    %132 = arith.addf %129, %131 : vector<4x1xf32>
    %cst_39 = arith.constant 0.001953125 : f32
    %133 = vector.broadcast %cst_39 : f32 to vector<4x1xf32>
    %134 = arith.mulf %132, %133 : vector<4x1xf32>
    %135 = vector.broadcast %134 : vector<4x1xf32> to vector<4x256xf32>
    %136 = arith.subf %72, %135 : vector<4x256xf32>
    %137 = vector.broadcast %134 : vector<4x1xf32> to vector<4x256xf32>
    %138 = arith.subf %72, %137 : vector<4x256xf32>
    %139 = arith.mulf %136, %138 : vector<4x256xf32>
    %cst_40 = arith.constant dense<0.000000e+00> : vector<4xf32>
    %140 = vector.multi_reduction <add>, %139, %cst_40 [1] : vector<4x256xf32> to vector<4xf32>
    %141 = vector.shape_cast %140 : vector<4xf32> to vector<4x1xf32>
    %cst_41 = arith.constant 0.000000e+00 : f32
    %142 = vector.broadcast %cst_41 : f32 to vector<4x1xf32>
    %143 = arith.addf %142, %141 : vector<4x1xf32>
    %144 = vector.broadcast %134 : vector<4x1xf32> to vector<4x256xf32>
    %145 = arith.subf %125, %144 : vector<4x256xf32>
    %146 = vector.broadcast %134 : vector<4x1xf32> to vector<4x256xf32>
    %147 = arith.subf %125, %146 : vector<4x256xf32>
    %148 = arith.mulf %145, %147 : vector<4x256xf32>
    %cst_42 = arith.constant dense<0.000000e+00> : vector<4xf32>
    %149 = vector.multi_reduction <add>, %148, %cst_42 [1] : vector<4x256xf32> to vector<4xf32>
    %150 = vector.shape_cast %149 : vector<4xf32> to vector<4x1xf32>
    %151 = arith.addf %143, %150 : vector<4x1xf32>
    %cst_43 = arith.constant 0.001953125 : f32
    %152 = vector.broadcast %cst_43 : f32 to vector<4x1xf32>
    %153 = arith.mulf %151, %152 : vector<4x1xf32>
    %154 = vector.extract_strided_slice %2 {offsets = [0, 0], sizes = [4, 1], strides = [1, 1]} : vector<4x4xf32> to vector<4x1xf32>
    %155 = vector.extract_strided_slice %2 {offsets = [0, 1], sizes = [4, 1], strides = [1, 1]} : vector<4x4xf32> to vector<4x1xf32>
    %cst_44 = arith.constant 9.99999974E-6 : f32
    %156 = vector.broadcast %cst_44 : f32 to vector<4x1xf32>
    %157 = arith.addf %153, %156 : vector<4x1xf32>
    %158 = math.rsqrt %157 : vector<4x1xf32>
    %159 = arith.mulf %158, %154 : vector<4x1xf32>
    %160 = arith.mulf %134, %159 : vector<4x1xf32>
    %161 = arith.subf %155, %160 : vector<4x1xf32>
    %162 = vector.broadcast %159 : vector<4x1xf32> to vector<4x256xf32>
    %163 = arith.mulf %72, %162 : vector<4x256xf32>
    %164 = vector.broadcast %161 : vector<4x1xf32> to vector<4x256xf32>
    %165 = arith.addf %163, %164 : vector<4x256xf32>
    %166 = vector.broadcast %159 : vector<4x1xf32> to vector<4x256xf32>
    %167 = arith.mulf %125, %166 : vector<4x256xf32>
    %168 = vector.broadcast %161 : vector<4x1xf32> to vector<4x256xf32>
    %169 = arith.addf %167, %168 : vector<4x256xf32>
    %cst_45 = arith.constant 0.000000e+00 : f32
    %170 = vector.broadcast %cst_45 : f32 to vector<4x256xf32>
    %171 = arith.maximumf %165, %170 : vector<4x256xf32>
    %cst_46 = arith.constant 0.000000e+00 : f32
    %172 = vector.broadcast %cst_46 : f32 to vector<4x256xf32>
    %173 = arith.maximumf %169, %172 : vector<4x256xf32>
    %c17_i32_47 = arith.constant 17 : i32
    %174 = tpu.dynamic_rotate %171 by %c17_i32_47 dim 1 : vector<4x256xf32>, i32 -> vector<4x256xf32>
    %175 = arith.mulf %174, %5 : vector<4x256xf32>
    %176 = vector.extract_strided_slice %1 {offsets = [1, 0, 0, 0], sizes = [1, 1, 4, 4], strides = [1, 1, 1, 1]} : vector<2x9x4x4xf32> to vector<1x1x4x4xf32>
    %177 = vector.shape_cast %176 : vector<1x1x4x4xf32> to vector<4x4xf32>
    %cst_48 = arith.constant dense<0.000000e+00> : vector<4x256xf32>
    %178 = tpu.matmul %177, %175, %cst_48 {dimension_numbers = #tpu.dot_dimension_numbers<[1], [0], [0], [1], [0, 0, 1, 1], [], []>} : vector<4x4xf32>, vector<4x256xf32>, vector<4x256xf32> -> vector<4x256xf32>
    %c16_i32_49 = arith.constant 16 : i32
    %179 = tpu.dynamic_rotate %171 by %c16_i32_49 dim 1 : vector<4x256xf32>, i32 -> vector<4x256xf32>
    %180 = arith.mulf %179, %7 : vector<4x256xf32>
    %181 = vector.extract_strided_slice %1 {offsets = [1, 1, 0, 0], sizes = [1, 1, 4, 4], strides = [1, 1, 1, 1]} : vector<2x9x4x4xf32> to vector<1x1x4x4xf32>
    %182 = vector.shape_cast %181 : vector<1x1x4x4xf32> to vector<4x4xf32>
    %cst_50 = arith.constant dense<0.000000e+00> : vector<4x256xf32>
    %183 = tpu.matmul %182, %180, %cst_50 {dimension_numbers = #tpu.dot_dimension_numbers<[1], [0], [0], [1], [0, 0, 1, 1], [], []>} : vector<4x4xf32>, vector<4x256xf32>, vector<4x256xf32> -> vector<4x256xf32>
    %184 = arith.addf %178, %183 : vector<4x256xf32>
    %c15_i32_51 = arith.constant 15 : i32
    %185 = tpu.dynamic_rotate %171 by %c15_i32_51 dim 1 : vector<4x256xf32>, i32 -> vector<4x256xf32>
    %186 = arith.mulf %185, %9 : vector<4x256xf32>
    %187 = vector.extract_strided_slice %1 {offsets = [1, 2, 0, 0], sizes = [1, 1, 4, 4], strides = [1, 1, 1, 1]} : vector<2x9x4x4xf32> to vector<1x1x4x4xf32>
    %188 = vector.shape_cast %187 : vector<1x1x4x4xf32> to vector<4x4xf32>
    %cst_52 = arith.constant dense<0.000000e+00> : vector<4x256xf32>
    %189 = tpu.matmul %188, %186, %cst_52 {dimension_numbers = #tpu.dot_dimension_numbers<[1], [0], [0], [1], [0, 0, 1, 1], [], []>} : vector<4x4xf32>, vector<4x256xf32>, vector<4x256xf32> -> vector<4x256xf32>
    %190 = arith.addf %184, %189 : vector<4x256xf32>
    %c1_i32_53 = arith.constant 1 : i32
    %191 = tpu.dynamic_rotate %171 by %c1_i32_53 dim 1 : vector<4x256xf32>, i32 -> vector<4x256xf32>
    %192 = arith.mulf %191, %11 : vector<4x256xf32>
    %193 = vector.extract_strided_slice %1 {offsets = [1, 3, 0, 0], sizes = [1, 1, 4, 4], strides = [1, 1, 1, 1]} : vector<2x9x4x4xf32> to vector<1x1x4x4xf32>
    %194 = vector.shape_cast %193 : vector<1x1x4x4xf32> to vector<4x4xf32>
    %cst_54 = arith.constant dense<0.000000e+00> : vector<4x256xf32>
    %195 = tpu.matmul %194, %192, %cst_54 {dimension_numbers = #tpu.dot_dimension_numbers<[1], [0], [0], [1], [0, 0, 1, 1], [], []>} : vector<4x4xf32>, vector<4x256xf32>, vector<4x256xf32> -> vector<4x256xf32>
    %196 = arith.addf %190, %195 : vector<4x256xf32>
    %197 = vector.extract_strided_slice %1 {offsets = [1, 4, 0, 0], sizes = [1, 1, 4, 4], strides = [1, 1, 1, 1]} : vector<2x9x4x4xf32> to vector<1x1x4x4xf32>
    %198 = vector.shape_cast %197 : vector<1x1x4x4xf32> to vector<4x4xf32>
    %cst_55 = arith.constant dense<0.000000e+00> : vector<4x256xf32>
    %199 = tpu.matmul %198, %171, %cst_55 {dimension_numbers = #tpu.dot_dimension_numbers<[1], [0], [0], [1], [0, 0, 1, 1], [], []>} : vector<4x4xf32>, vector<4x256xf32>, vector<4x256xf32> -> vector<4x256xf32>
    %200 = arith.addf %196, %199 : vector<4x256xf32>
    %c255_i32_56 = arith.constant 255 : i32
    %201 = tpu.dynamic_rotate %171 by %c255_i32_56 dim 1 : vector<4x256xf32>, i32 -> vector<4x256xf32>
    %202 = arith.mulf %201, %13 : vector<4x256xf32>
    %203 = vector.extract_strided_slice %1 {offsets = [1, 5, 0, 0], sizes = [1, 1, 4, 4], strides = [1, 1, 1, 1]} : vector<2x9x4x4xf32> to vector<1x1x4x4xf32>
    %204 = vector.shape_cast %203 : vector<1x1x4x4xf32> to vector<4x4xf32>
    %cst_57 = arith.constant dense<0.000000e+00> : vector<4x256xf32>
    %205 = tpu.matmul %204, %202, %cst_57 {dimension_numbers = #tpu.dot_dimension_numbers<[1], [0], [0], [1], [0, 0, 1, 1], [], []>} : vector<4x4xf32>, vector<4x256xf32>, vector<4x256xf32> -> vector<4x256xf32>
    %206 = arith.addf %200, %205 : vector<4x256xf32>
    %c241_i32_58 = arith.constant 241 : i32
    %207 = tpu.dynamic_rotate %171 by %c241_i32_58 dim 1 : vector<4x256xf32>, i32 -> vector<4x256xf32>
    %208 = arith.mulf %207, %15 : vector<4x256xf32>
    %209 = vector.extract_strided_slice %1 {offsets = [1, 6, 0, 0], sizes = [1, 1, 4, 4], strides = [1, 1, 1, 1]} : vector<2x9x4x4xf32> to vector<1x1x4x4xf32>
    %210 = vector.shape_cast %209 : vector<1x1x4x4xf32> to vector<4x4xf32>
    %cst_59 = arith.constant dense<0.000000e+00> : vector<4x256xf32>
    %211 = tpu.matmul %210, %208, %cst_59 {dimension_numbers = #tpu.dot_dimension_numbers<[1], [0], [0], [1], [0, 0, 1, 1], [], []>} : vector<4x4xf32>, vector<4x256xf32>, vector<4x256xf32> -> vector<4x256xf32>
    %212 = arith.addf %206, %211 : vector<4x256xf32>
    %c240_i32_60 = arith.constant 240 : i32
    %213 = tpu.dynamic_rotate %171 by %c240_i32_60 dim 1 : vector<4x256xf32>, i32 -> vector<4x256xf32>
    %214 = arith.mulf %213, %17 : vector<4x256xf32>
    %215 = vector.extract_strided_slice %1 {offsets = [1, 7, 0, 0], sizes = [1, 1, 4, 4], strides = [1, 1, 1, 1]} : vector<2x9x4x4xf32> to vector<1x1x4x4xf32>
    %216 = vector.shape_cast %215 : vector<1x1x4x4xf32> to vector<4x4xf32>
    %cst_61 = arith.constant dense<0.000000e+00> : vector<4x256xf32>
    %217 = tpu.matmul %216, %214, %cst_61 {dimension_numbers = #tpu.dot_dimension_numbers<[1], [0], [0], [1], [0, 0, 1, 1], [], []>} : vector<4x4xf32>, vector<4x256xf32>, vector<4x256xf32> -> vector<4x256xf32>
    %218 = arith.addf %212, %217 : vector<4x256xf32>
    %c239_i32_62 = arith.constant 239 : i32
    %219 = tpu.dynamic_rotate %171 by %c239_i32_62 dim 1 : vector<4x256xf32>, i32 -> vector<4x256xf32>
    %220 = arith.mulf %219, %19 : vector<4x256xf32>
    %221 = vector.extract_strided_slice %1 {offsets = [1, 8, 0, 0], sizes = [1, 1, 4, 4], strides = [1, 1, 1, 1]} : vector<2x9x4x4xf32> to vector<1x1x4x4xf32>
    %222 = vector.shape_cast %221 : vector<1x1x4x4xf32> to vector<4x4xf32>
    %cst_63 = arith.constant dense<0.000000e+00> : vector<4x256xf32>
    %223 = tpu.matmul %222, %220, %cst_63 {dimension_numbers = #tpu.dot_dimension_numbers<[1], [0], [0], [1], [0, 0, 1, 1], [], []>} : vector<4x4xf32>, vector<4x256xf32>, vector<4x256xf32> -> vector<4x256xf32>
    %224 = arith.addf %218, %223 : vector<4x256xf32>
    %c17_i32_64 = arith.constant 17 : i32
    %225 = tpu.dynamic_rotate %173 by %c17_i32_64 dim 1 : vector<4x256xf32>, i32 -> vector<4x256xf32>
    %226 = arith.mulf %225, %5 : vector<4x256xf32>
    %227 = vector.extract_strided_slice %1 {offsets = [1, 0, 0, 0], sizes = [1, 1, 4, 4], strides = [1, 1, 1, 1]} : vector<2x9x4x4xf32> to vector<1x1x4x4xf32>
    %228 = vector.shape_cast %227 : vector<1x1x4x4xf32> to vector<4x4xf32>
    %cst_65 = arith.constant dense<0.000000e+00> : vector<4x256xf32>
    %229 = tpu.matmul %228, %226, %cst_65 {dimension_numbers = #tpu.dot_dimension_numbers<[1], [0], [0], [1], [0, 0, 1, 1], [], []>} : vector<4x4xf32>, vector<4x256xf32>, vector<4x256xf32> -> vector<4x256xf32>
    %c16_i32_66 = arith.constant 16 : i32
    %230 = tpu.dynamic_rotate %173 by %c16_i32_66 dim 1 : vector<4x256xf32>, i32 -> vector<4x256xf32>
    %231 = arith.mulf %230, %7 : vector<4x256xf32>
    %232 = vector.extract_strided_slice %1 {offsets = [1, 1, 0, 0], sizes = [1, 1, 4, 4], strides = [1, 1, 1, 1]} : vector<2x9x4x4xf32> to vector<1x1x4x4xf32>
    %233 = vector.shape_cast %232 : vector<1x1x4x4xf32> to vector<4x4xf32>
    %cst_67 = arith.constant dense<0.000000e+00> : vector<4x256xf32>
    %234 = tpu.matmul %233, %231, %cst_67 {dimension_numbers = #tpu.dot_dimension_numbers<[1], [0], [0], [1], [0, 0, 1, 1], [], []>} : vector<4x4xf32>, vector<4x256xf32>, vector<4x256xf32> -> vector<4x256xf32>
    %235 = arith.addf %229, %234 : vector<4x256xf32>
    %c15_i32_68 = arith.constant 15 : i32
    %236 = tpu.dynamic_rotate %173 by %c15_i32_68 dim 1 : vector<4x256xf32>, i32 -> vector<4x256xf32>
    %237 = arith.mulf %236, %9 : vector<4x256xf32>
    %238 = vector.extract_strided_slice %1 {offsets = [1, 2, 0, 0], sizes = [1, 1, 4, 4], strides = [1, 1, 1, 1]} : vector<2x9x4x4xf32> to vector<1x1x4x4xf32>
    %239 = vector.shape_cast %238 : vector<1x1x4x4xf32> to vector<4x4xf32>
    %cst_69 = arith.constant dense<0.000000e+00> : vector<4x256xf32>
    %240 = tpu.matmul %239, %237, %cst_69 {dimension_numbers = #tpu.dot_dimension_numbers<[1], [0], [0], [1], [0, 0, 1, 1], [], []>} : vector<4x4xf32>, vector<4x256xf32>, vector<4x256xf32> -> vector<4x256xf32>
    %241 = arith.addf %235, %240 : vector<4x256xf32>
    %c1_i32_70 = arith.constant 1 : i32
    %242 = tpu.dynamic_rotate %173 by %c1_i32_70 dim 1 : vector<4x256xf32>, i32 -> vector<4x256xf32>
    %243 = arith.mulf %242, %11 : vector<4x256xf32>
    %244 = vector.extract_strided_slice %1 {offsets = [1, 3, 0, 0], sizes = [1, 1, 4, 4], strides = [1, 1, 1, 1]} : vector<2x9x4x4xf32> to vector<1x1x4x4xf32>
    %245 = vector.shape_cast %244 : vector<1x1x4x4xf32> to vector<4x4xf32>
    %cst_71 = arith.constant dense<0.000000e+00> : vector<4x256xf32>
    %246 = tpu.matmul %245, %243, %cst_71 {dimension_numbers = #tpu.dot_dimension_numbers<[1], [0], [0], [1], [0, 0, 1, 1], [], []>} : vector<4x4xf32>, vector<4x256xf32>, vector<4x256xf32> -> vector<4x256xf32>
    %247 = arith.addf %241, %246 : vector<4x256xf32>
    %248 = vector.extract_strided_slice %1 {offsets = [1, 4, 0, 0], sizes = [1, 1, 4, 4], strides = [1, 1, 1, 1]} : vector<2x9x4x4xf32> to vector<1x1x4x4xf32>
    %249 = vector.shape_cast %248 : vector<1x1x4x4xf32> to vector<4x4xf32>
    %cst_72 = arith.constant dense<0.000000e+00> : vector<4x256xf32>
    %250 = tpu.matmul %249, %173, %cst_72 {dimension_numbers = #tpu.dot_dimension_numbers<[1], [0], [0], [1], [0, 0, 1, 1], [], []>} : vector<4x4xf32>, vector<4x256xf32>, vector<4x256xf32> -> vector<4x256xf32>
    %251 = arith.addf %247, %250 : vector<4x256xf32>
    %c255_i32_73 = arith.constant 255 : i32
    %252 = tpu.dynamic_rotate %173 by %c255_i32_73 dim 1 : vector<4x256xf32>, i32 -> vector<4x256xf32>
    %253 = arith.mulf %252, %13 : vector<4x256xf32>
    %254 = vector.extract_strided_slice %1 {offsets = [1, 5, 0, 0], sizes = [1, 1, 4, 4], strides = [1, 1, 1, 1]} : vector<2x9x4x4xf32> to vector<1x1x4x4xf32>
    %255 = vector.shape_cast %254 : vector<1x1x4x4xf32> to vector<4x4xf32>
    %cst_74 = arith.constant dense<0.000000e+00> : vector<4x256xf32>
    %256 = tpu.matmul %255, %253, %cst_74 {dimension_numbers = #tpu.dot_dimension_numbers<[1], [0], [0], [1], [0, 0, 1, 1], [], []>} : vector<4x4xf32>, vector<4x256xf32>, vector<4x256xf32> -> vector<4x256xf32>
    %257 = arith.addf %251, %256 : vector<4x256xf32>
    %c241_i32_75 = arith.constant 241 : i32
    %258 = tpu.dynamic_rotate %173 by %c241_i32_75 dim 1 : vector<4x256xf32>, i32 -> vector<4x256xf32>
    %259 = arith.mulf %258, %15 : vector<4x256xf32>
    %260 = vector.extract_strided_slice %1 {offsets = [1, 6, 0, 0], sizes = [1, 1, 4, 4], strides = [1, 1, 1, 1]} : vector<2x9x4x4xf32> to vector<1x1x4x4xf32>
    %261 = vector.shape_cast %260 : vector<1x1x4x4xf32> to vector<4x4xf32>
    %cst_76 = arith.constant dense<0.000000e+00> : vector<4x256xf32>
    %262 = tpu.matmul %261, %259, %cst_76 {dimension_numbers = #tpu.dot_dimension_numbers<[1], [0], [0], [1], [0, 0, 1, 1], [], []>} : vector<4x4xf32>, vector<4x256xf32>, vector<4x256xf32> -> vector<4x256xf32>
    %263 = arith.addf %257, %262 : vector<4x256xf32>
    %c240_i32_77 = arith.constant 240 : i32
    %264 = tpu.dynamic_rotate %173 by %c240_i32_77 dim 1 : vector<4x256xf32>, i32 -> vector<4x256xf32>
    %265 = arith.mulf %264, %17 : vector<4x256xf32>
    %266 = vector.extract_strided_slice %1 {offsets = [1, 7, 0, 0], sizes = [1, 1, 4, 4], strides = [1, 1, 1, 1]} : vector<2x9x4x4xf32> to vector<1x1x4x4xf32>
    %267 = vector.shape_cast %266 : vector<1x1x4x4xf32> to vector<4x4xf32>
    %cst_78 = arith.constant dense<0.000000e+00> : vector<4x256xf32>
    %268 = tpu.matmul %267, %265, %cst_78 {dimension_numbers = #tpu.dot_dimension_numbers<[1], [0], [0], [1], [0, 0, 1, 1], [], []>} : vector<4x4xf32>, vector<4x256xf32>, vector<4x256xf32> -> vector<4x256xf32>
    %269 = arith.addf %263, %268 : vector<4x256xf32>
    %c239_i32_79 = arith.constant 239 : i32
    %270 = tpu.dynamic_rotate %173 by %c239_i32_79 dim 1 : vector<4x256xf32>, i32 -> vector<4x256xf32>
    %271 = arith.mulf %270, %19 : vector<4x256xf32>
    %272 = vector.extract_strided_slice %1 {offsets = [1, 8, 0, 0], sizes = [1, 1, 4, 4], strides = [1, 1, 1, 1]} : vector<2x9x4x4xf32> to vector<1x1x4x4xf32>
    %273 = vector.shape_cast %272 : vector<1x1x4x4xf32> to vector<4x4xf32>
    %cst_80 = arith.constant dense<0.000000e+00> : vector<4x256xf32>
    %274 = tpu.matmul %273, %271, %cst_80 {dimension_numbers = #tpu.dot_dimension_numbers<[1], [0], [0], [1], [0, 0, 1, 1], [], []>} : vector<4x4xf32>, vector<4x256xf32>, vector<4x256xf32> -> vector<4x256xf32>
    %275 = arith.addf %269, %274 : vector<4x256xf32>
    %cst_81 = arith.constant dense<0.000000e+00> : vector<4xf32>
    %276 = vector.multi_reduction <add>, %224, %cst_81 [1] : vector<4x256xf32> to vector<4xf32>
    %277 = vector.shape_cast %276 : vector<4xf32> to vector<4x1xf32>
    %cst_82 = arith.constant 0.000000e+00 : f32
    %278 = vector.broadcast %cst_82 : f32 to vector<4x1xf32>
    %279 = arith.addf %278, %277 : vector<4x1xf32>
    %cst_83 = arith.constant dense<0.000000e+00> : vector<4xf32>
    %280 = vector.multi_reduction <add>, %275, %cst_83 [1] : vector<4x256xf32> to vector<4xf32>
    %281 = vector.shape_cast %280 : vector<4xf32> to vector<4x1xf32>
    %282 = arith.addf %279, %281 : vector<4x1xf32>
    %cst_84 = arith.constant 0.001953125 : f32
    %283 = vector.broadcast %cst_84 : f32 to vector<4x1xf32>
    %284 = arith.mulf %282, %283 : vector<4x1xf32>
    %285 = vector.broadcast %284 : vector<4x1xf32> to vector<4x256xf32>
    %286 = arith.subf %224, %285 : vector<4x256xf32>
    %287 = vector.broadcast %284 : vector<4x1xf32> to vector<4x256xf32>
    %288 = arith.subf %224, %287 : vector<4x256xf32>
    %289 = arith.mulf %286, %288 : vector<4x256xf32>
    %cst_85 = arith.constant dense<0.000000e+00> : vector<4xf32>
    %290 = vector.multi_reduction <add>, %289, %cst_85 [1] : vector<4x256xf32> to vector<4xf32>
    %291 = vector.shape_cast %290 : vector<4xf32> to vector<4x1xf32>
    %cst_86 = arith.constant 0.000000e+00 : f32
    %292 = vector.broadcast %cst_86 : f32 to vector<4x1xf32>
    %293 = arith.addf %292, %291 : vector<4x1xf32>
    %294 = vector.broadcast %284 : vector<4x1xf32> to vector<4x256xf32>
    %295 = arith.subf %275, %294 : vector<4x256xf32>
    %296 = vector.broadcast %284 : vector<4x1xf32> to vector<4x256xf32>
    %297 = arith.subf %275, %296 : vector<4x256xf32>
    %298 = arith.mulf %295, %297 : vector<4x256xf32>
    %cst_87 = arith.constant dense<0.000000e+00> : vector<4xf32>
    %299 = vector.multi_reduction <add>, %298, %cst_87 [1] : vector<4x256xf32> to vector<4xf32>
    %300 = vector.shape_cast %299 : vector<4xf32> to vector<4x1xf32>
    %301 = arith.addf %293, %300 : vector<4x1xf32>
    %cst_88 = arith.constant 0.001953125 : f32
    %302 = vector.broadcast %cst_88 : f32 to vector<4x1xf32>
    %303 = arith.mulf %301, %302 : vector<4x1xf32>
    %304 = vector.extract_strided_slice %2 {offsets = [0, 2], sizes = [4, 1], strides = [1, 1]} : vector<4x4xf32> to vector<4x1xf32>
    %305 = vector.extract_strided_slice %2 {offsets = [0, 3], sizes = [4, 1], strides = [1, 1]} : vector<4x4xf32> to vector<4x1xf32>
    %cst_89 = arith.constant 9.99999974E-6 : f32
    %306 = vector.broadcast %cst_89 : f32 to vector<4x1xf32>
    %307 = arith.addf %303, %306 : vector<4x1xf32>
    %308 = math.rsqrt %307 : vector<4x1xf32>
    %309 = arith.mulf %308, %304 : vector<4x1xf32>
    %310 = arith.mulf %284, %309 : vector<4x1xf32>
    %311 = arith.subf %305, %310 : vector<4x1xf32>
    %312 = vector.broadcast %309 : vector<4x1xf32> to vector<4x256xf32>
    %313 = arith.mulf %224, %312 : vector<4x256xf32>
    %314 = vector.broadcast %311 : vector<4x1xf32> to vector<4x256xf32>
    %315 = arith.addf %313, %314 : vector<4x256xf32>
    %316 = vector.broadcast %309 : vector<4x1xf32> to vector<4x256xf32>
    %317 = arith.mulf %275, %316 : vector<4x256xf32>
    %318 = vector.broadcast %311 : vector<4x1xf32> to vector<4x256xf32>
    %319 = arith.addf %317, %318 : vector<4x256xf32>
    %320 = vector.extract_strided_slice %0 {offsets = [0, 0, 0], sizes = [1, 4, 256], strides = [1, 1, 1]} : vector<2x4x256xf32> to vector<1x4x256xf32>
    %321 = vector.shape_cast %320 : vector<1x4x256xf32> to vector<4x256xf32>
    %322 = arith.addf %315, %321 : vector<4x256xf32>
    %cst_90 = arith.constant 0.000000e+00 : f32
    %323 = vector.broadcast %cst_90 : f32 to vector<4x256xf32>
    %324 = arith.maximumf %322, %323 : vector<4x256xf32>
    %c0_91 = arith.constant 0 : index
    %c0_92 = arith.constant 0 : index
    %c0_93 = arith.constant 0 : index
    %325 = vector.load %arg4[%c0_91, %c0_92, %c0_93] : memref<2x4x256xf32, #tpu.memory_space<vmem>>, vector<1x4x256xf32>
    %326 = vector.shape_cast %325 : vector<1x4x256xf32> to vector<4x256xf32>
    %327 = vector.shape_cast %324 : vector<4x256xf32> to vector<1x4x256xf32>
    tpu.vector_store %arg4[%c0_91, %c0_92, %c0_93], %327 {strides = array<i32>} : memref<2x4x256xf32, #tpu.memory_space<vmem>>, vector<1x4x256xf32>,
    %328 = vector.extract_strided_slice %0 {offsets = [1, 0, 0], sizes = [1, 4, 256], strides = [1, 1, 1]} : vector<2x4x256xf32> to vector<1x4x256xf32>
    %329 = vector.shape_cast %328 : vector<1x4x256xf32> to vector<4x256xf32>
    %330 = arith.addf %319, %329 : vector<4x256xf32>
    %cst_94 = arith.constant 0.000000e+00 : f32
    %331 = vector.broadcast %cst_94 : f32 to vector<4x256xf32>
    %332 = arith.maximumf %330, %331 : vector<4x256xf32>
    %c1 = arith.constant 1 : index
    %c0_95 = arith.constant 0 : index
    %c0_96 = arith.constant 0 : index
    %333 = vector.load %arg4[%c1, %c0_95, %c0_96] : memref<2x4x256xf32, #tpu.memory_space<vmem>>, vector<1x4x256xf32>
    %334 = vector.shape_cast %333 : vector<1x4x256xf32> to vector<4x256xf32>
    %335 = vector.shape_cast %332 : vector<4x256xf32> to vector<1x4x256xf32>
    tpu.vector_store %arg4[%c1, %c0_95, %c0_96], %335 {strides = array<i32>} : memref<2x4x256xf32, #tpu.memory_space<vmem>>, vector<1x4x256xf32>,
    return
  }
}

</mosaic_0001>

<bundles_post_ra>
// kernel: resnet_block.1
= control target key start
LH: loop header
LB: loop body
LE: loop exit
PB: predicated region body
PF: predicated region fallthrough
CT: control target
= control target key end

     0   :  { %v3578_v2 = vmov 0.0   ;;  %s3579_s19 = smov 16   ;;  %s3580_s20 = smov 17   ;;  %v53_v5 = vlaneseq  ;;  %vm79_vm1 = vcmask 1043456   ;;  %vm75_vm3 = vcmask 31744   ;;  %s4291_s0 = inlined_call_operand.vmem [shape: f32[2,4,256], index: 0, kind: input, shape index: {}, may-alias: {0,4}]   ;;  %s4292_s3 = inlined_call_operand.vmem [shape: f32[9,4,256], index: 3, kind: input, shape index: {}]   ;;  %s4293_s1 = inlined_call_operand.vmem [shape: f32[2,9,4,4], index: 1, kind: input, shape index: {}]   ;;  %s4294_s2 = inlined_call_operand.vmem [shape: f32[4,4], index: 2, kind: input, shape index: {}]   ;;  %s4295_s4 = inlined_call_operand.vmem [shape: f32[2,4,256], index: 4, kind: output, shape index: {}, may-alias: {0,4}]  }
   0x1   :  { %v3619_v0 = vld [vmem:[%s4291_s0 + $0x8] sm:$0xff]  ;;  %v3624_v1 = vld [vmem:[%s4291_s0] sm:$0xff]  ;;  %150 = vmatprep.mubr.f32.mxu0 %v3578_v2  ;;  %970 = vmatprep.mubr.f32.mxu1 %v3578_v2  ;;  %s3581_s21 = smov 15   ;;  %s3582_s22 = smov 1   ;;  %v3752_v30 = vld [vmem:[%s4292_s3 + $0x10] sm:$0xff] }
   0x2   :  { %892 = vrot.lane.b32.xlu1 %v3619_v0, %s3579_s19  ;;  %63 = vrot.lane.b32.xlu0 %v3624_v1, %s3579_s19  ;;  %v3634_v3 = vcombine.high %v3619_v0, %v3619_v0  ;;  %v3638_v4 = vcombine.high %v3624_v1, %v3624_v1  ;;  %s3583_s23 = smov 127   ;;  %s3584_s24 = smov 113   ;;  %v3700_v6 = vand.u32 127, %v53_v5  ;;  %v3705_v7 = vld [vmem:[%s4292_s3 + $0x8] sm:$0xff]  ;;  %v3710_v10 = vld [vmem:[%s4292_s3] sm:$0xff]  ;;  %v3767_v37 = vcombine.high %v3752_v30, %v3752_v30 }
   0x3   :  { %s3585_s25 = smov 112   ;;  %s3586_s26 = smov 111   ;;  %v3715_v11 = vcombine.high %v3705_v7, %v3705_v7  ;;  %v3720_v14 = vcombine.high %v3710_v10, %v3710_v10  ;;  %v20_v23 = vld [vmem:[%s4293_s1 + $0x4] sm:$0xf]  ;;  %v19_v38 = vld [vmem:[%s4293_s1] sm:$0xf] }
   0x4   :  { %vm67_vm0 = vcmp.lt.s32.totalorder %v3700_v6, 16  ;;  %vm55_vm2 = vcmp.lt.s32.totalorder %v3700_v6, 17  ;;  %vm241_vm4 = vcmp.lt.s32.totalorder %v3700_v6, 15  ;;  %v3785_v45 = vld [vmem:[%s4292_s3 + $0x18] sm:$0xff]  ;;  %vm335_vm5 = vcmp.lt.s32.totalorder %v3700_v6, 1  ;;  %v3820_v60 = vld [vmem:[%s4292_s3 + $0x28] sm:$0xff] }
   0x5   :  { %v3800_v52 = vcombine.high %v3785_v45, %v3785_v45  ;;  %v21_v53 = vld [vmem:[%s4293_s1 + $0x8] sm:$0xf]  ;;  %vm509_vm6 = vcmp.lt.s32.totalorder %v3700_v6, 127  ;;  %vm603_vm7 = vcmp.lt.s32.totalorder %v3700_v6, 113  ;;  %vm697_vm8 = vcmp.lt.s32.totalorder %v3700_v6, 112 }
   0x6   :  { %894 = vrot.lane.b32.xlu1 %v3634_v3, %s3579_s19  ;;  %65 = vrot.lane.b32.xlu0 %v3638_v4, %s3579_s19  ;;  %vm791_vm9 = vcmp.lt.s32.totalorder %v3700_v6, 111  ;;  %v36_v6 = vld [vmem:[%s4293_s1 + $0x44] sm:$0xf] }
   0xa   :  { %51 = vrot.lane.b32.xlu1 %v3638_v4, %s3580_s20  ;;  %49 = vrot.lane.b32.xlu0 %v3624_v1, %s3580_s20 }
   0xe   :  { %886 = vrot.lane.b32.xlu1 %v3634_v3, %s3580_s20  ;;  %884 = vrot.lane.b32.xlu0 %v3619_v0, %s3580_s20 }
  0x12   :  { %239 = vrot.lane.b32.xlu1 %v3638_v4, %s3581_s21  ;;  %237 = vrot.lane.b32.xlu0 %v3624_v1, %s3581_s21 }
  0x16   :  { %1056 = vrot.lane.b32.xlu1 %v3634_v3, %s3581_s21  ;;  %1054 = vrot.lane.b32.xlu0 %v3619_v0, %s3581_s21 }
  0x1a   :  { %333 = vrot.lane.b32.xlu1 %v3638_v4, %s3582_s22  ;;  %331 = vrot.lane.b32.xlu0 %v3624_v1, %s3582_s22 }
  0x1e   :  { %1143 = vrot.lane.b32.xlu1 %v3634_v3, %s3582_s22  ;;  %1141 = vrot.lane.b32.xlu0 %v3619_v0, %s3582_s22 }
  0x22   :  { %507 = vrot.lane.b32.xlu1 %v3638_v4, %s3583_s23  ;;  %505 = vrot.lane.b32.xlu0 %v3624_v1, %s3583_s23 }
  0x26   :  { %1307 = vrot.lane.b32.xlu1 %v3634_v3, %s3583_s23  ;;  %1305 = vrot.lane.b32.xlu0 %v3619_v0, %s3583_s23 }
  0x2a   :  { %601 = vrot.lane.b32.xlu1 %v3638_v4, %s3584_s24  ;;  %599 = vrot.lane.b32.xlu0 %v3624_v1, %s3584_s24 }
  0x2e   :  { %1394 = vrot.lane.b32.xlu1 %v3634_v3, %s3584_s24  ;;  %1392 = vrot.lane.b32.xlu0 %v3619_v0, %s3584_s24 }
  0x32   :  { %695 = vrot.lane.b32.xlu1 %v3638_v4, %s3585_s25  ;;  %693 = vrot.lane.b32.xlu0 %v3624_v1, %s3585_s25 }
  0x36   :  { %1481 = vrot.lane.b32.xlu1 %v3634_v3, %s3585_s25  ;;  %1479 = vrot.lane.b32.xlu0 %v3619_v0, %s3585_s25 }
  0x3a   :  { %789 = vrot.lane.b32.xlu1 %v3638_v4, %s3586_s26  ;;  %787 = vrot.lane.b32.xlu0 %v3624_v1, %s3586_s26 }
  0x3e   :  { %1568 = vrot.lane.b32.xlu1 %v3634_v3, %s3586_s26  ;;  %1566 = vrot.lane.b32.xlu0 %v3619_v0, %s3586_s26 }
  0x74   :  { %v893_v8 = vpop.permute.xlu1 %892  ;;  %v64_v9 = vpop.permute.xlu0 %63 }
  0x78   :  { %v895_v12 = vpop.permute.xlu1 %894  ;;  %v66_v13 = vpop.permute.xlu0 %65 }
  0x79   :  { %v896_v15 = vsel %vm67_vm0, %v893_v8, %v895_v12  ;;  %v897_v16 = vsel %vm67_vm0, %v895_v12, %v893_v8  ;;  %v68_v17 = vsel %vm67_vm0, %v64_v9, %v66_v13  ;;  %v69_v18 = vsel %vm67_vm0, %v66_v13, %v64_v9  ;;  %v22_v13 = vld [vmem:[%s4293_s1 + $0xc] sm:$0xf] }
  0x7a   :  { %v898_v19 = vmul.f32 %v897_v16, %v3705_v7  ;;  %v73_v20 = vmul.f32 %v69_v18, %v3705_v7  ;;  %v899_v21 = vmul.f32 %v896_v15, %v3715_v11  ;;  %v74_v22 = vmul.f32 %v3715_v11, %v68_v17 }
  0x7b   :  { %v3833_v12 = vcombine.high %v3820_v60, %v3820_v60 }
  0x7c   :  { %3398 = vmatprep.subr.msk.mxu1 %vm79_vm1, %v899_v21  ;;  %v52_v24 = vpop.permute.xlu1 %51  ;;  %3371 = vmatprep.subr.msk.mxu0 %vm79_vm1, %v74_v22  ;;  %v50_v25 = vpop.permute.xlu0 %49 }
  0x7d   :  { %v56_v26 = vsel %vm55_vm2, %v50_v25, %v52_v24  ;;  %v57_v27 = vsel %vm55_vm2, %v52_v24, %v50_v25  ;;  %3372 = vmatpush1.msk.msra.mxu0 %vm79_vm1, %v73_v20  ;;  %3399 = vmatpush1.msk.msra.mxu1 %vm79_vm1, %v898_v19  ;;  %v3854_v19 = vld [vmem:[%s4292_s3 + $0x30] sm:$0xff] }
  0x7e   :  { %v61_v28 = vmul.f32 %v57_v27, %v3710_v10  ;;  %v62_v29 = vmul.f32 %v3720_v14, %v56_v26  ;;  %3373 = vmatmul.mubr.msk.f32.vlgmr.msra.gmra.mrb[0].mxu0 %vm75_vm3, %v20_v23  ;;  %3400 = vmatmul.mubr.msk.f32.vlgmr.msra.gmra.mrb[0].mxu1 %vm75_vm3, %v20_v23  ;;  %v3871_v25 = vcombine.high %v3854_v19, %v3854_v19  ;;  %v23_v26 = vld [vmem:[%s4293_s1 + $0x10] sm:$0xf] }
  0x7f   :  { %230 = vmatprep.mubr.f32.mxu0 %v3578_v2  ;;  %1047 = vmatprep.mubr.f32.mxu1 %v3578_v2 }
  0x80   :  { %v887_v31 = vpop.permute.xlu1 %886  ;;  %3374 = vmatprep.subr.msk.mxu0 %vm79_vm1, %v62_v29  ;;  %v885_v32 = vpop.permute.xlu0 %884 }
  0x81   :  { %v888_v33 = vsel %vm55_vm2, %v885_v32, %v887_v31  ;;  %v889_v34 = vsel %vm55_vm2, %v887_v31, %v885_v32  ;;  %3375 = vmatpush1.msk.msra.mxu0 %vm79_vm1, %v61_v28 }
  0x82   :  { %v890_v35 = vmul.f32 %v889_v34, %v3710_v10  ;;  %v891_v36 = vmul.f32 %v888_v33, %v3720_v14  ;;  %v3889_v33 = vld [vmem:[%s4292_s3 + $0x38] sm:$0xff] }
  0x84   :  { %v240_v39 = vpop.permute.xlu1 %239  ;;  %3401 = vmatprep.subr.msk.mxu1 %vm79_vm1, %v891_v36  ;;  %v238_v40 = vpop.permute.xlu0 %237 }
  0x85   :  { %v242_v41 = vsel %vm241_vm4, %v238_v40, %v240_v39  ;;  %v243_v42 = vsel %vm241_vm4, %v240_v39, %v238_v40  ;;  %3402 = vmatpush1.msk.msra.mxu1 %vm79_vm1, %v890_v35 }
  0x86   :  { %v247_v43 = vmul.f32 %v243_v42, %v3752_v30  ;;  %v248_v44 = vmul.f32 %v3767_v37, %v242_v41  ;;  %3376 = vmatmul.mubr.msk.f32.vlgmr.msra.gmra.mrb[0].mxu0 %vm75_vm3, %v19_v38  ;;  %3403 = vmatmul.mubr.msk.f32.vlgmr.msra.gmra.mrb[0].mxu1 %vm75_vm3, %v19_v38  ;;  %v3904_v41 = vcombine.high %v3889_v33, %v3889_v33 }
  0x87   :  { %322 = vmatprep.mubr.f32.mxu0 %v3578_v2  ;;  %1132 = vmatprep.mubr.f32.mxu1 %v3578_v2 }
  0x88   :  { %v1057_v46 = vpop.permute.xlu1 %1056  ;;  %3377 = vmatprep.subr.msk.mxu0 %vm79_vm1, %v248_v44  ;;  %v1055_v47 = vpop.permute.xlu0 %1054 }
  0x89   :  { %v1058_v48 = vsel %vm241_vm4, %v1055_v47, %v1057_v46  ;;  %v1059_v49 = vsel %vm241_vm4, %v1057_v46, %v1055_v47  ;;  %3378 = vmatpush1.msk.msra.mxu0 %vm79_vm1, %v247_v43  ;;  %v24_v43 = vld [vmem:[%s4293_s1 + $0x14] sm:$0xf] }
  0x8a   :  { %v1060_v50 = vmul.f32 %v1059_v49, %v3752_v30  ;;  %v1061_v51 = vmul.f32 %v1058_v48, %v3767_v37 }
  0x8c   :  { %v334_v54 = vpop.permute.xlu1 %333  ;;  %3404 = vmatprep.subr.msk.mxu1 %vm79_vm1, %v1061_v51  ;;  %v332_v55 = vpop.permute.xlu0 %331 }
  0x8d   :  { %v336_v56 = vsel %vm335_vm5, %v332_v55, %v334_v54  ;;  %v337_v57 = vsel %vm335_vm5, %v334_v54, %v332_v55  ;;  %3405 = vmatpush1.msk.msra.mxu1 %vm79_vm1, %v1060_v50  ;;  %v3922_v50 = vld [vmem:[%s4292_s3 + $0x40] sm:$0xff] }
  0x8e   :  { %v341_v58 = vmul.f32 %v337_v57, %v3785_v45  ;;  %v342_v59 = vmul.f32 %v3800_v52, %v336_v56  ;;  %3379 = vmatmul.mubr.msk.f32.vlgmr.msra.gmra.mrb[0].mxu0 %vm75_vm3, %v21_v53  ;;  %3406 = vmatmul.mubr.msk.f32.vlgmr.msra.gmra.mrb[0].mxu1 %vm75_vm3, %v21_v53 }
  0x8f   :  { %416 = vmatprep.mubr.f32.mxu0 %v3578_v2  ;;  %1219 = vmatprep.mubr.f32.mxu1 %v3578_v2 }
  0x90   :  { %v1144_v61 = vpop.permute.xlu1 %1143  ;;  %3380 = vmatprep.subr.msk.mxu0 %vm79_vm1, %v342_v59  ;;  %v1142_v62 = vpop.permute.xlu0 %1141 }
  0x91   :  { %v1145_v63 = vsel %vm335_vm5, %v1142_v62, %v1144_v61  ;;  %v1146_v5 = vsel %vm335_vm5, %v1144_v61, %v1142_v62  ;;  %3381 = vmatpush1.msk.msra.mxu0 %vm79_vm1, %v341_v58  ;;  %v3937_v58 = vcombine.high %v3922_v50, %v3922_v50  ;;  %v25_v61 = vld [vmem:[%s4293_s1 + $0x18] sm:$0xf] }
  0x92   :  { %v1147_v8 = vmul.f32 %v1146_v5, %v3785_v45  ;;  %v1148_v9 = vmul.f32 %v1145_v63, %v3800_v52  ;;  %3383 = vmatprep.subr.msk.mxu0 %vm79_vm1, %v3638_v4 }
  0x94   :  { %3407 = vmatprep.subr.msk.mxu1 %vm79_vm1, %v1148_v9  ;;  %v508_v15 = vpop.permute.xlu1 %507  ;;  %v506_v16 = vpop.permute.xlu0 %505 }
  0x95   :  { %3408 = vmatpush1.msk.msra.mxu1 %vm79_vm1, %v1147_v8  ;;  %v511_v17 = vsel %vm509_vm6, %v508_v15, %v506_v16  ;;  %v510_v20 = vsel %vm509_vm6, %v506_v16, %v508_v15 }
  0x96   :  { %3382 = vmatmul.mubr.msk.f32.vlgmr.msra.gmra.mrb[0].mxu0 %vm75_vm3, %v22_v13  ;;  %3409 = vmatmul.mubr.msk.f32.vlgmr.msra.gmra.mrb[0].mxu1 %vm75_vm3, %v22_v13  ;;  %v516_v18 = vmul.f32 %v3833_v12, %v511_v17 }
  0x97   :  { %3410 = vmatprep.subr.msk.mxu1 %vm79_vm1, %v3634_v3  ;;  %3384 = vmatpush1.msk.msra.mxu0 %vm79_vm1, %v3624_v1 }
  0x98   :  { %496 = vmatprep.mubr.f32.mxu0 %v3578_v2  ;;  %3411 = vmatpush1.msk.msra.mxu1 %vm79_vm1, %v3619_v0  ;;  %v1308_v21 = vpop.permute.xlu1 %1307  ;;  %v1306_v22 = vpop.permute.xlu0 %1305  ;;  %v515_v0 = vmul.f32 %v510_v20, %v3820_v60 }
  0x99   :  { %1296 = vmatprep.mubr.f32.mxu1 %v3578_v2  ;;  %3386 = vmatprep.subr.msk.mxu0 %vm79_vm1, %v516_v18  ;;  %v1309_v1 = vsel %vm509_vm6, %v1306_v22, %v1308_v21  ;;  %v1310_v23 = vsel %vm509_vm6, %v1308_v21, %v1306_v22  ;;  %v26_v22 = vld [vmem:[%s4293_s1 + $0x1c] sm:$0xf] }
  0x9a   :  { %v1312_v24 = vmul.f32 %v1310_v23, %v3833_v12  ;;  %v1311_v27 = vmul.f32 %v1309_v1, %v3820_v60  ;;  %v27_v23 = vld [vmem:[%s4293_s1 + $0x20] sm:$0xf] }
  0x9c   :  { %v602_v28 = vpop.permute.xlu1 %601  ;;  %3413 = vmatprep.subr.msk.mxu1 %vm79_vm1, %v1312_v24  ;;  %v600_v29 = vpop.permute.xlu0 %599 }
  0x9d   :  { %v605_v31 = vsel %vm603_vm7, %v602_v28, %v600_v29  ;;  %v604_v34 = vsel %vm603_vm7, %v600_v29, %v602_v28 }
  0x9e   :  { %3385 = vmatmul.mubr.msk.f32.vlgmr.msra.gmra.mrb[0].mxu0 %vm75_vm3, %v23_v26  ;;  %3412 = vmatmul.mubr.msk.f32.vlgmr.msra.gmra.mrb[0].mxu1 %vm75_vm3, %v23_v26  ;;  %v610_v32 = vmul.f32 %v3871_v25, %v605_v31  ;;  %v609_v42 = vmul.f32 %v604_v34, %v3854_v19 }
  0x9f   :  { %3387 = vmatpush1.msk.msra.mxu0 %vm79_vm1, %v515_v0  ;;  %3414 = vmatpush1.msk.msra.mxu1 %vm79_vm1, %v1311_v27 }
  0xa0   :  { %590 = vmatprep.mubr.f32.mxu0 %v3578_v2  ;;  %1383 = vmatprep.mubr.f32.mxu1 %v3578_v2  ;;  %v1395_v35 = vpop.permute.xlu1 %1394  ;;  %v1393_v36 = vpop.permute.xlu0 %1392 }
  0xa1   :  { %3389 = vmatprep.subr.msk.mxu0 %vm79_vm1, %v610_v32  ;;  %v1396_v38 = vsel %vm603_vm7, %v1393_v36, %v1395_v35  ;;  %v1397_v39 = vsel %vm603_vm7, %v1395_v35, %v1393_v36 }
  0xa2   :  { %v1399_v40 = vmul.f32 %v1397_v39, %v3871_v25  ;;  %v1398_v44 = vmul.f32 %v1396_v38, %v3854_v19 }
  0xa4   :  { %v696_v46 = vpop.permute.xlu1 %695  ;;  %3416 = vmatprep.subr.msk.mxu1 %vm79_vm1, %v1399_v40  ;;  %v694_v47 = vpop.permute.xlu0 %693 }
  0xa5   :  { %v699_v48 = vsel %vm697_vm8, %v696_v46, %v694_v47  ;;  %v698_v51 = vsel %vm697_vm8, %v694_v47, %v696_v46 }
  0xa6   :  { %3388 = vmatmul.mubr.msk.f32.vlgmr.msra.gmra.mrb[0].mxu0 %vm75_vm3, %v24_v43  ;;  %3415 = vmatmul.mubr.msk.f32.vlgmr.msra.gmra.mrb[0].mxu1 %vm75_vm3, %v24_v43  ;;  %v704_v49 = vmul.f32 %v3904_v41, %v699_v48  ;;  %v703_v59 = vmul.f32 %v698_v51, %v3889_v33 }
  0xa7   :  { %3390 = vmatpush1.msk.msra.mxu0 %vm79_vm1, %v609_v42  ;;  %3417 = vmatpush1.msk.msra.mxu1 %vm79_vm1, %v1398_v44 }
  0xa8   :  { %684 = vmatprep.mubr.f32.mxu0 %v3578_v2  ;;  %1470 = vmatprep.mubr.f32.mxu1 %v3578_v2  ;;  %v1482_v53 = vpop.permute.xlu1 %1481  ;;  %v1480_v54 = vpop.permute.xlu0 %1479 }
  0xa9   :  { %3392 = vmatprep.subr.msk.mxu0 %vm79_vm1, %v704_v49  ;;  %v1483_v55 = vsel %vm697_vm8, %v1480_v54, %v1482_v53  ;;  %v1484_v56 = vsel %vm697_vm8, %v1482_v53, %v1480_v54 }
  0xaa   :  { %v1486_v57 = vmul.f32 %v1484_v56, %v3904_v41  ;;  %v1485_v62 = vmul.f32 %v1483_v55, %v3889_v33 }
  0xac   :  { %v790_v63 = vpop.permute.xlu1 %789  ;;  %3419 = vmatprep.subr.msk.mxu1 %vm79_vm1, %v1486_v57  ;;  %v788_v5 = vpop.permute.xlu0 %787 }
  0xad   :  { %v793_v8 = vsel %vm791_vm9, %v790_v63, %v788_v5  ;;  %v792_v13 = vsel %vm791_vm9, %v788_v5, %v790_v63 }
  0xae   :  { %3391 = vmatmul.mubr.msk.f32.vlgmr.msra.gmra.mrb[0].mxu0 %vm75_vm3, %v25_v61  ;;  %3418 = vmatmul.mubr.msk.f32.vlgmr.msra.gmra.mrb[0].mxu1 %vm75_vm3, %v25_v61  ;;  %v798_v9 = vmul.f32 %v3937_v58, %v793_v8  ;;  %v797_v21 = vmul.f32 %v792_v13, %v3922_v50  ;;  %v3587_v61 = vmov 0   ;;  %v3588_v13 = vmov 1  }
  0xaf   :  { %3393 = vmatpush1.msk.msra.mxu0 %vm79_vm1, %v703_v59  ;;  %3420 = vmatpush1.msk.msra.mxu1 %vm79_vm1, %v1485_v62 }
  0xb0   :  { %778 = vmatprep.mubr.f32.mxu0 %v3578_v2  ;;  %1557 = vmatprep.mubr.f32.mxu1 %v3578_v2  ;;  %v1569_v15 = vpop.permute.xlu1 %1568  ;;  %v1567_v16 = vpop.permute.xlu0 %1566 }
  0xb1   :  { %3395 = vmatprep.subr.msk.mxu0 %vm79_vm1, %v798_v9  ;;  %v1570_v17 = vsel %vm791_vm9, %v1567_v16, %v1569_v15  ;;  %v1571_v18 = vsel %vm791_vm9, %v1569_v15, %v1567_v16  ;;  %3557 = vset.pattern.permute.xlu0 %v3587_v61  ;;  %v3992_v15 = vld [vmem:[%s4294_s2] sm:$0xf] }
  0xb2   :  { %v1573_v20 = vmul.f32 %v1571_v18, %v3937_v58  ;;  %v1572_v1 = vmul.f32 %v1570_v17, %v3922_v50  ;;  %3558 = vset.pattern.permute.xlu1 %v3588_v13 }
  0xb4   :  { %3422 = vmatprep.subr.msk.mxu1 %vm79_vm1, %v1573_v20 }
  0xb6   :  { %3394 = vmatmul.mubr.msk.f32.vlgmr.msra.gmra.mrb[0].mxu0 %vm75_vm3, %v26_v22  ;;  %3421 = vmatmul.mubr.msk.f32.vlgmr.msra.gmra.mrb[0].mxu1 %vm75_vm3, %v26_v22 }
  0xb7   :  { %3396 = vmatpush1.msk.msra.mxu0 %vm79_vm1, %v797_v21  ;;  %3423 = vmatpush1.msk.msra.mxu1 %vm79_vm1, %v1572_v1 }
  0xb8   :  { %872 = vmatprep.mubr.f32.mxu0 %v3578_v2  ;;  %1644 = vmatprep.mubr.f32.mxu1 %v3578_v2 }
  0xbe   :  { %3397 = vmatmul.mubr.msk.f32.vlgmr.msra.gmra.mrb[0].mxu0 %vm75_vm3, %v27_v23  ;;  %3424 = vmatmul.mubr.msk.f32.vlgmr.msra.gmra.mrb[0].mxu1 %vm75_vm3, %v27_v23 }
  0xbf   :  { %1807 = vmatprep.mubr.f32.mxu0 %v3578_v2  ;;  %2602 = vmatprep.mubr.f32.mxu1 %v3578_v2 }
 0x191   :  { %v874_v24 = vpop.f32.mrb[0].mxu0  ;;  %v1646_v0 = vpop.f32.mrb[0].mxu1 }
 0x192   :  { %v876_v26 = vpop.f32.mrb[1].mxu0  ;;  %v1648_v27 = vpop.f32.mrb[1].mxu1  ;;  %v1653_v28 = vsel %vm79_vm1, %v874_v24, 0.0  ;;  %v1659_v29 = vsel %vm79_vm1, %v1646_v0, 0.0 }
 0x193   :  { %v1654_v31 = vsel %vm79_vm1, %v876_v26, 0.0  ;;  %v1660_v32 = vsel %vm79_vm1, %v1648_v27, 0.0 }
 0x194   :  { %v1655_v34 = vadd.f32 %v1654_v31, %v1653_v28  ;;  %v1661_v35 = vadd.f32 %v1660_v32, %v1659_v29 }
 0x196   :  { %1656 = vadd.xlane.f32.xlu0 %v1655_v34  ;;  %1662 = vadd.xlane.f32.xlu1 %v1661_v35 }
 0x223   :  { %v1663_v36 = vpop.xlane.xlu1 %1662  ;;  %v1657_v38 = vpop.xlane.xlu0 %1656 }
 0x224   :  { %v1664_v39 = vadd.f32 %v1663_v36, %v1657_v38 }
 0x226   :  { %v1665_v40 = vmul.f32 0.001953125, %v1664_v39 }
 0x228   :  { %v1666_v42 = vsub.f32 %v874_v24, %v1665_v40  ;;  %v1667_v43 = vsub.f32 %v876_v26, %v1665_v40  ;;  %v1676_v44 = vsub.f32 %v1646_v0, %v1665_v40  ;;  %v1677_v46 = vsub.f32 %v1648_v27, %v1665_v40 }
 0x22a   :  { %v1668_v47 = vmul.f32 %v1666_v42, %v1666_v42  ;;  %v1669_v48 = vmul.f32 %v1667_v43, %v1667_v43  ;;  %v1678_v49 = vmul.f32 %v1676_v44, %v1676_v44  ;;  %v1679_v51 = vmul.f32 %v1677_v46, %v1677_v46 }
 0x22c   :  { %v1670_v53 = vsel %vm79_vm1, %v1668_v47, 0.0  ;;  %v1671_v54 = vsel %vm79_vm1, %v1669_v48, 0.0  ;;  %v1680_v55 = vsel %vm79_vm1, %v1678_v49, 0.0  ;;  %v1681_v56 = vsel %vm79_vm1, %v1679_v51, 0.0  ;;  %v29_v48 = vld [vmem:[%s4293_s1 + $0x28] sm:$0xf] }
 0x22d   :  { %v1672_v57 = vadd.f32 %v1671_v54, %v1670_v53  ;;  %v1682_v59 = vadd.f32 %v1681_v56, %v1680_v55 }
 0x22f   :  { %1673 = vadd.xlane.f32.xlu0 %v1672_v57 }
 0x233   :  { %1683 = vadd.xlane.f32.xlu0 %v1682_v59 }
 0x2bc   :  { %v1674_v62 = vpop.xlane.xlu0 %1673 }
 0x2c0   :  { %v1684_v63 = vpop.xlane.xlu0 %1683 }
 0x2c1   :  { %v1685_v5 = vadd.f32 %v1684_v63, %v1674_v62 }
 0x2c3   :  { %v1686_v8 = vmul.f32 0.001953125, %v1685_v5 }
 0x2c5   :  { %v1687_v9 = vadd.f32 1e-05, %v1686_v8  ;;  %v28_v8 = vld [vmem:[%s4293_s1 + $0x24] sm:$0xf] }
 0x2c7   :  { %3572 = vrsqrt.f32 %v1687_v9 }
 0x2d1   :  { %v3573_v16 = vpop.eup %3572 }
 0x2d2   :  { %v1689_v17 = vmul.f32 %v3573_v16, %v3992_v15 }
 0x2d4   :  { %1698 = vperm.xlu0 %3557, %v1689_v17   ;;  %v1690_v18 = vmul.f32 %v1689_v17, %v1665_v40 }
 0x2d6   :  { %1692 = vrot.lane.b32.xlu1 %v1690_v18, %s3582_s22 }
 0x348   :  { %v1693_v20 = vpop.permute.xlu1 %1692 }
 0x349   :  { %v1695_v21 = vsub.f32 %v3992_v15, %v1693_v20 }
 0x34b   :  { %1705 = vperm.xlu1 %3558, %v1695_v21  }
 0x353   :  { %v1699_v22 = vpop.permute.xlu0 %1698 }
 0x354   :  { %v1701_v1 = vmul.f32 %v1699_v22, %v874_v24  ;;  %v1711_v23 = vmul.f32 %v1699_v22, %v1648_v27  ;;  %v1702_v29 = vmul.f32 %v1699_v22, %v876_v26  ;;  %v1710_v38 = vmul.f32 %v1699_v22, %v1646_v0 }
 0x3ca   :  { %v1706_v28 = vpop.permute.xlu1 %1705 }
 0x3cb   :  { %v1708_v31 = vadd.f32 %v1706_v28, %v1701_v1  ;;  %v1713_v32 = vadd.f32 %v1711_v23, %v1706_v28  ;;  %v1709_v34 = vadd.f32 %v1706_v28, %v1702_v29  ;;  %v1712_v39 = vadd.f32 %v1710_v38, %v1706_v28  ;;  %v30_v28 = vld [vmem:[%s4293_s1 + $0x2c] sm:$0xf] }
 0x3cd   :  { %v3997_v35 = vmax.f32 %v1708_v31, 0.0  ;;  %v3999_v36 = vmax.f32 %v1713_v32, 0.0  ;;  %v4005_v40 = vmax.f32 %v1709_v34, 0.0  ;;  %v4011_v24 = vmax.f32 %v1712_v39, 0.0 }
 0x3cf   :  { %1726 = vrot.lane.b32.xlu1 %v3997_v35, %s3579_s19  ;;  %2518 = vrot.lane.b32.xlu0 %v3999_v36, %s3580_s20 }
 0x3d3   :  { %1728 = vrot.lane.b32.xlu1 %v4005_v40, %s3579_s19  ;;  %1896 = vrot.lane.b32.xlu0 %v4005_v40, %s3581_s21 }
 0x3d7   :  { %2688 = vrot.lane.b32.xlu0 %v3999_v36, %s3581_s21  ;;  %2524 = vrot.lane.b32.xlu1 %v4011_v24, %s3579_s19 }
 0x3db   :  { %1986 = vrot.lane.b32.xlu0 %v4005_v40, %s3582_s22  ;;  %2526 = vrot.lane.b32.xlu1 %v3999_v36, %s3579_s19 }
 0x3df   :  { %2775 = vrot.lane.b32.xlu0 %v3999_v36, %s3582_s22  ;;  %1718 = vrot.lane.b32.xlu1 %v3997_v35, %s3580_s20 }
 0x3e3   :  { %2158 = vrot.lane.b32.xlu0 %v4005_v40, %s3583_s23  ;;  %1720 = vrot.lane.b32.xlu1 %v4005_v40, %s3580_s20 }
 0x3e7   :  { %2941 = vrot.lane.b32.xlu0 %v3999_v36, %s3583_s23  ;;  %2516 = vrot.lane.b32.xlu1 %v4011_v24, %s3580_s20 }
 0x3eb   :  { %2248 = vrot.lane.b32.xlu0 %v4005_v40, %s3584_s24  ;;  %1894 = vrot.lane.b32.xlu1 %v3997_v35, %s3581_s21 }
 0x3ef   :  { %3028 = vrot.lane.b32.xlu0 %v3999_v36, %s3584_s24  ;;  %2686 = vrot.lane.b32.xlu1 %v4011_v24, %s3581_s21 }
 0x3f3   :  { %2338 = vrot.lane.b32.xlu0 %v4005_v40, %s3585_s25  ;;  %1984 = vrot.lane.b32.xlu1 %v3997_v35, %s3582_s22 }
 0x3f7   :  { %3115 = vrot.lane.b32.xlu0 %v3999_v36, %s3585_s25  ;;  %2773 = vrot.lane.b32.xlu1 %v4011_v24, %s3582_s22 }
 0x3fb   :  { %2428 = vrot.lane.b32.xlu0 %v4005_v40, %s3586_s26  ;;  %2156 = vrot.lane.b32.xlu1 %v3997_v35, %s3583_s23 }
 0x3ff   :  { %3202 = vrot.lane.b32.xlu0 %v3999_v36, %s3586_s26  ;;  %2939 = vrot.lane.b32.xlu1 %v4011_v24, %s3583_s23 }
 0x403   :  { %2246 = vrot.lane.b32.xlu1 %v3997_v35, %s3584_s24 }
 0x407   :  { %3026 = vrot.lane.b32.xlu1 %v4011_v24, %s3584_s24 }
 0x40b   :  { %2336 = vrot.lane.b32.xlu1 %v3997_v35, %s3585_s25 }
 0x40f   :  { %3113 = vrot.lane.b32.xlu1 %v4011_v24, %s3585_s25 }
 0x413   :  { %2426 = vrot.lane.b32.xlu1 %v3997_v35, %s3586_s26 }
 0x417   :  { %3200 = vrot.lane.b32.xlu1 %v4011_v24, %s3586_s26 }
 0x441   :  { %v1727_v0 = vpop.permute.xlu1 %1726  ;;  %v2519_v26 = vpop.permute.xlu0 %2518 }
 0x445   :  { %v1729_v27 = vpop.permute.xlu1 %1728  ;;  %v1897_v47 = vpop.permute.xlu0 %1896 }
 0x446   :  { %v1730_v42 = vsel %vm67_vm0, %v1727_v0, %v1729_v27  ;;  %v1731_v43 = vsel %vm67_vm0, %v1729_v27, %v1727_v0 }
 0x447   :  { %v1732_v44 = vmul.f32 %v1731_v43, %v3705_v7  ;;  %v1733_v46 = vmul.f32 %v1730_v42, %v3715_v11  ;;  %v31_v42 = vld [vmem:[%s4293_s1 + $0x30] sm:$0xf] }
 0x449   :  { %3425 = vmatprep.subr.msk.mxu0 %vm79_vm1, %v1733_v46  ;;  %v2525_v49 = vpop.permute.xlu1 %2524  ;;  %v2689_v51 = vpop.permute.xlu0 %2688 }
 0x44a   :  { %3426 = vmatpush1.msk.msra.mxu0 %vm79_vm1, %v1732_v44 }
 0x44b   :  { %3427 = vmatmul.mubr.msk.f32.vlgmr.msra.gmra.mrb[2].mxu0 %vm75_vm3, %v29_v48 }
 0x44c   :  { %1887 = vmatprep.mubr.f32.mxu0 %v3578_v2 }
 0x44d   :  { %v2527_v53 = vpop.permute.xlu1 %2526  ;;  %v1987_v61 = vpop.permute.xlu0 %1986 }
 0x44e   :  { %v2528_v54 = vsel %vm67_vm0, %v2525_v49, %v2527_v53  ;;  %v2529_v55 = vsel %vm67_vm0, %v2527_v53, %v2525_v49 }
 0x44f   :  { %v2530_v56 = vmul.f32 %v2529_v55, %v3705_v7  ;;  %v2531_v57 = vmul.f32 %v2528_v54, %v3715_v11 }
 0x451   :  { %3452 = vmatprep.subr.msk.mxu1 %vm79_vm1, %v2531_v57  ;;  %v1719_v59 = vpop.permute.xlu1 %1718  ;;  %v2776_v9 = vpop.permute.xlu0 %2775 }
 0x452   :  { %3453 = vmatpush1.msk.msra.mxu1 %vm79_vm1, %v2530_v56 }
 0x453   :  { %3454 = vmatmul.mubr.msk.f32.vlgmr.msra.gmra.mrb[2].mxu1 %vm75_vm3, %v29_v48 }
 0x454   :  { %2679 = vmatprep.mubr.f32.mxu1 %v3578_v2 }
 0x455   :  { %v1721_v62 = vpop.permute.xlu1 %1720  ;;  %v2159_v23 = vpop.permute.xlu0 %2158 }
 0x456   :  { %v1722_v63 = vsel %vm55_vm2, %v1719_v59, %v1721_v62  ;;  %v1723_v5 = vsel %vm55_vm2, %v1721_v62, %v1719_v59 }
 0x457   :  { %v1724_v7 = vmul.f32 %v1723_v5, %v3710_v10  ;;  %v1725_v11 = vmul.f32 %v1722_v63, %v3720_v14  ;;  %v33_v5 = vld [vmem:[%s4293_s1 + $0x38] sm:$0xf] }
 0x459   :  { %3428 = vmatprep.subr.msk.mxu0 %vm79_vm1, %v1725_v11  ;;  %v2517_v13 = vpop.permute.xlu1 %2516  ;;  %v2942_v39 = vpop.permute.xlu0 %2941 }
 0x45a   :  { %v2520_v16 = vsel %vm55_vm2, %v2517_v13, %v2519_v26  ;;  %v2521_v17 = vsel %vm55_vm2, %v2519_v26, %v2517_v13  ;;  %3429 = vmatpush1.msk.msra.mxu0 %vm79_vm1, %v1724_v7 }
 0x45b   :  { %v2522_v18 = vmul.f32 %v2521_v17, %v3710_v10  ;;  %v2523_v20 = vmul.f32 %v2520_v16, %v3720_v14  ;;  %3430 = vmatmul.mubr.msk.f32.vlgmr.msra.gmra.mrb[2].mxu0 %vm75_vm3, %v28_v8 }
 0x45c   :  { %1975 = vmatprep.mubr.f32.mxu0 %v3578_v2 }
 0x45d   :  { %3455 = vmatprep.subr.msk.mxu1 %vm79_vm1, %v2523_v20  ;;  %v1895_v21 = vpop.permute.xlu1 %1894 }
 0x45e   :  { %v1898_v22 = vsel %vm241_vm4, %v1895_v21, %v1897_v47  ;;  %v1899_v1 = vsel %vm241_vm4, %v1897_v47, %v1895_v21  ;;  %3456 = vmatpush1.msk.msra.mxu1 %vm79_vm1, %v2522_v18  ;;  %v2249_v47 = vpop.permute.xlu0 %2248  ;;  %v34_v21 = vld [vmem:[%s4293_s1 + $0x3c] sm:$0xf] }
 0x45f   :  { %v1900_v10 = vmul.f32 %v1899_v1, %v3752_v30  ;;  %v1901_v14 = vmul.f32 %v1898_v22, %v3767_v37  ;;  %3457 = vmatmul.mubr.msk.f32.vlgmr.msra.gmra.mrb[2].mxu1 %vm75_vm3, %v28_v8 }
 0x460   :  { %2764 = vmatprep.mubr.f32.mxu1 %v3578_v2 }
 0x461   :  { %3431 = vmatprep.subr.msk.mxu0 %vm79_vm1, %v1901_v14  ;;  %v2687_v29 = vpop.permute.xlu1 %2686 }
 0x462   :  { %v2690_v31 = vsel %vm241_vm4, %v2687_v29, %v2689_v51  ;;  %v2691_v32 = vsel %vm241_vm4, %v2689_v51, %v2687_v29  ;;  %3432 = vmatpush1.msk.msra.mxu0 %vm79_vm1, %v1900_v10 }
 0x463   :  { %v2692_v34 = vmul.f32 %v2691_v32, %v3752_v30  ;;  %v2693_v38 = vmul.f32 %v2690_v31, %v3767_v37  ;;  %3433 = vmatmul.mubr.msk.f32.vlgmr.msra.gmra.mrb[2].mxu0 %vm75_vm3, %v30_v28 }
 0x464   :  { %2065 = vmatprep.mubr.f32.mxu0 %v3578_v2 }
 0x465   :  { %3458 = vmatprep.subr.msk.mxu1 %vm79_vm1, %v2693_v38  ;;  %v1985_v0 = vpop.permute.xlu1 %1984 }
 0x466   :  { %v1988_v26 = vsel %vm335_vm5, %v1985_v0, %v1987_v61  ;;  %v1989_v27 = vsel %vm335_vm5, %v1987_v61, %v1985_v0  ;;  %3459 = vmatpush1.msk.msra.mxu1 %vm79_vm1, %v2692_v34 }
 0x467   :  { %v1990_v30 = vmul.f32 %v1989_v27, %v3785_v45  ;;  %v1991_v37 = vmul.f32 %v1988_v26, %v3800_v52  ;;  %3460 = vmatmul.mubr.msk.f32.vlgmr.msra.gmra.mrb[2].mxu1 %vm75_vm3, %v30_v28 }
 0x468   :  { %2851 = vmatprep.mubr.f32.mxu1 %v3578_v2 }
 0x469   :  { %3434 = vmatprep.subr.msk.mxu0 %vm79_vm1, %v1991_v37  ;;  %v2774_v43 = vpop.permute.xlu1 %2773 }
 0x46a   :  { %v2777_v44 = vsel %vm335_vm5, %v2774_v43, %v2776_v9  ;;  %v2778_v46 = vsel %vm335_vm5, %v2776_v9, %v2774_v43  ;;  %3435 = vmatpush1.msk.msra.mxu0 %vm79_vm1, %v1990_v30 }
 0x46b   :  { %v2779_v48 = vmul.f32 %v2778_v46, %v3785_v45  ;;  %v2780_v49 = vmul.f32 %v2777_v44, %v3800_v52  ;;  %3436 = vmatmul.mubr.msk.f32.vlgmr.msra.gmra.mrb[2].mxu0 %vm75_vm3, %v31_v42  ;;  %3437 = vmatprep.subr.msk.mxu0 %vm79_vm1, %v4005_v40  ;;  %v3029_v40 = vpop.permute.xlu0 %3028 }
 0x46c   :  { %3438 = vmatpush1.msk.msra.mxu0 %vm79_vm1, %v3997_v35  ;;  %2147 = vmatprep.mubr.f32.mxu0 %v3578_v2  ;;  %v32_v35 = vld [vmem:[%s4293_s1 + $0x34] sm:$0xf] }
 0x46d   :  { %3461 = vmatprep.subr.msk.mxu1 %vm79_vm1, %v2780_v49  ;;  %v2157_v51 = vpop.permute.xlu1 %2156 }
 0x46e   :  { %v2161_v53 = vsel %vm509_vm6, %v2159_v23, %v2157_v51  ;;  %3462 = vmatpush1.msk.msra.mxu1 %vm79_vm1, %v2779_v48  ;;  %v2160_v45 = vsel %vm509_vm6, %v2157_v51, %v2159_v23 }
 0x46f   :  { %v2163_v52 = vmul.f32 %v2161_v53, %v3833_v12  ;;  %3463 = vmatmul.mubr.msk.f32.vlgmr.msra.gmra.mrb[2].mxu1 %vm75_vm3, %v31_v42  ;;  %3464 = vmatprep.subr.msk.mxu1 %vm79_vm1, %v3999_v36  ;;  %v2162_v55 = vmul.f32 %v2160_v45, %v3820_v60  ;;  %v2339_v62 = vpop.permute.xlu0 %2338 }
 0x470   :  { %3465 = vmatpush1.msk.msra.mxu1 %vm79_vm1, %v4011_v24  ;;  %2930 = vmatprep.mubr.f32.mxu1 %v3578_v2 }
 0x471   :  { %3440 = vmatprep.subr.msk.mxu0 %vm79_vm1, %v2163_v52  ;;  %v2940_v54 = vpop.permute.xlu1 %2939 }
 0x472   :  { %v2944_v56 = vsel %vm509_vm6, %v2942_v39, %v2940_v54  ;;  %v2943_v36 = vsel %vm509_vm6, %v2940_v54, %v2942_v39 }
 0x473   :  { %v2946_v24 = vmul.f32 %v2944_v56, %v3833_v12  ;;  %3439 = vmatmul.mubr.msk.f32.vlgmr.msra.gmra.mrb[2].mxu0 %vm75_vm3, %v32_v35  ;;  %v2945_v59 = vmul.f32 %v2943_v36, %v3820_v60  ;;  %v3116_v13 = vpop.permute.xlu0 %3115 }
 0x474   :  { %3441 = vmatpush1.msk.msra.mxu0 %vm79_vm1, %v2162_v55  ;;  %2237 = vmatprep.mubr.f32.mxu0 %v3578_v2 }
 0x475   :  { %3467 = vmatprep.subr.msk.mxu1 %vm79_vm1, %v2946_v24  ;;  %v2247_v57 = vpop.permute.xlu1 %2246 }
 0x476   :  { %v2251_v61 = vsel %vm603_vm7, %v2249_v47, %v2247_v57  ;;  %v2250_v63 = vsel %vm603_vm7, %v2247_v57, %v2249_v47 }
 0x477   :  { %v2253_v12 = vmul.f32 %v2251_v61, %v3871_v25  ;;  %3466 = vmatmul.mubr.msk.f32.vlgmr.msra.gmra.mrb[2].mxu1 %vm75_vm3, %v32_v35  ;;  %v2252_v7 = vmul.f32 %v2250_v63, %v3854_v19  ;;  %v2429_v23 = vpop.permute.xlu0 %2428 }
 0x478   :  { %3468 = vmatpush1.msk.msra.mxu1 %vm79_vm1, %v2945_v59  ;;  %3017 = vmatprep.mubr.f32.mxu1 %v3578_v2 }
 0x479   :  { %3443 = vmatprep.subr.msk.mxu0 %vm79_vm1, %v2253_v12  ;;  %v3027_v60 = vpop.permute.xlu1 %3026 }
 0x47a   :  { %v3031_v11 = vsel %vm603_vm7, %v3029_v40, %v3027_v60  ;;  %v3030_v8 = vsel %vm603_vm7, %v3027_v60, %v3029_v40 }
 0x47b   :  { %v3033_v9 = vmul.f32 %v3031_v11, %v3871_v25  ;;  %3442 = vmatmul.mubr.msk.f32.vlgmr.msra.gmra.mrb[2].mxu0 %vm75_vm3, %v33_v5  ;;  %v3032_v17 = vmul.f32 %v3030_v8, %v3854_v19  ;;  %v3203_v38 = vpop.permute.xlu0 %3202 }
 0x47c   :  { %3444 = vmatpush1.msk.msra.mxu0 %vm79_vm1, %v2252_v7  ;;  %2327 = vmatprep.mubr.f32.mxu0 %v3578_v2 }
 0x47d   :  { %3470 = vmatprep.subr.msk.mxu1 %vm79_vm1, %v3033_v9  ;;  %v2337_v16 = vpop.permute.xlu1 %2336 }
 0x47e   :  { %v2341_v18 = vsel %vm697_vm8, %v2339_v62, %v2337_v16  ;;  %v2340_v20 = vsel %vm697_vm8, %v2337_v16, %v2339_v62 }
 0x47f   :  { %v2343_v25 = vmul.f32 %v2341_v18, %v3904_v41  ;;  %3469 = vmatmul.mubr.msk.f32.vlgmr.msra.gmra.mrb[2].mxu1 %vm75_vm3, %v33_v5  ;;  %v2342_v22 = vmul.f32 %v2340_v20, %v3889_v33  ;;  %v3589_v5 = vmov 2  }
 0x480   :  { %3471 = vmatpush1.msk.msra.mxu1 %vm79_vm1, %v3032_v17  ;;  %3104 = vmatprep.mubr.f32.mxu1 %v3578_v2 }
 0x481   :  { %3446 = vmatprep.subr.msk.mxu0 %vm79_vm1, %v2343_v25  ;;  %v3114_v19 = vpop.permute.xlu1 %3113  ;;  %3559 = vset.pattern.permute.xlu1 %v3589_v5 }
 0x482   :  { %v3118_v1 = vsel %vm697_vm8, %v3116_v13, %v3114_v19  ;;  %v3117_v10 = vsel %vm697_vm8, %v3114_v19, %v3116_v13  ;;  %v3590_v13 = vmov 3  }
 0x483   :  { %v3120_v14 = vmul.f32 %v3118_v1, %v3904_v41  ;;  %3445 = vmatmul.mubr.msk.f32.vlgmr.msra.gmra.mrb[2].mxu0 %vm75_vm3, %v34_v21  ;;  %v3119_v29 = vmul.f32 %v3117_v10, %v3889_v33  ;;  %v35_v41 = vld [vmem:[%s4293_s1 + $0x40] sm:$0xf]  ;;  %3561 = vset.pattern.permute.xlu0 %v3590_v13 }
 0x484   :  { %3447 = vmatpush1.msk.msra.mxu0 %vm79_vm1, %v2342_v22  ;;  %2417 = vmatprep.mubr.f32.mxu0 %v3578_v2 }
 0x485   :  { %3473 = vmatprep.subr.msk.mxu1 %vm79_vm1, %v3120_v14  ;;  %v2427_v28 = vpop.permute.xlu1 %2426 }
 0x486   :  { %v2431_v31 = vsel %vm791_vm9, %v2429_v23, %v2427_v28  ;;  %v2430_v32 = vsel %vm791_vm9, %v2427_v28, %v2429_v23 }
 0x487   :  { %v2433_v34 = vmul.f32 %v2431_v31, %v3937_v58  ;;  %3472 = vmatmul.mubr.msk.f32.vlgmr.msra.gmra.mrb[2].mxu1 %vm75_vm3, %v34_v21  ;;  %v2432_v39 = vmul.f32 %v2430_v32, %v3922_v50  ;;  %v3576_v32 = vld [vmem:[%s4291_s0] sm:$0xff] }
 0x488   :  { %3474 = vmatpush1.msk.msra.mxu1 %vm79_vm1, %v3119_v29  ;;  %3191 = vmatprep.mubr.f32.mxu1 %v3578_v2 }
 0x489   :  { %3449 = vmatprep.subr.msk.mxu0 %vm79_vm1, %v2433_v34  ;;  %v3201_v33 = vpop.permute.xlu1 %3200 }
 0x48a   :  { %v3205_v0 = vsel %vm791_vm9, %v3203_v38, %v3201_v33  ;;  %v3204_v26 = vsel %vm791_vm9, %v3201_v33, %v3203_v38 }
 0x48b   :  { %v3207_v27 = vmul.f32 %v3205_v0, %v3937_v58  ;;  %3448 = vmatmul.mubr.msk.f32.vlgmr.msra.gmra.mrb[2].mxu0 %vm75_vm3, %v35_v41  ;;  %v3206_v30 = vmul.f32 %v3204_v26, %v3922_v50 }
 0x48c   :  { %3450 = vmatpush1.msk.msra.mxu0 %vm79_vm1, %v2432_v39  ;;  %2507 = vmatprep.mubr.f32.mxu0 %v3578_v2 }
 0x48d   :  { %3476 = vmatprep.subr.msk.mxu1 %vm79_vm1, %v3207_v27 }
 0x48f   :  { %3475 = vmatmul.mubr.msk.f32.vlgmr.msra.gmra.mrb[2].mxu1 %vm75_vm3, %v35_v41 }
 0x490   :  { %3477 = vmatpush1.msk.msra.mxu1 %vm79_vm1, %v3206_v30  ;;  %3278 = vmatprep.mubr.f32.mxu1 %v3578_v2 }
 0x493   :  { %3451 = vmatmul.mubr.msk.f32.vlgmr.msra.gmra.mrb[2].mxu0 %vm75_vm3, %v36_v6 }
 0x497   :  { %3478 = vmatmul.mubr.msk.f32.vlgmr.msra.gmra.mrb[2].mxu1 %vm75_vm3, %v36_v6 }
 0x566   :  { %v2509_v58 = vpop.f32.mrb[2].mxu0 }
 0x567   :  { %v2511_v37 = vpop.f32.mrb[3].mxu0  ;;  %v3287_v42 = vsel %vm79_vm1, %v2509_v58, 0.0 }
 0x568   :  { %v3288_v50 = vsel %vm79_vm1, %v2511_v37, 0.0 }
 0x569   :  { %v3289_v43 = vadd.f32 %v3288_v50, %v3287_v42 }
 0x56a   :  { %v3280_v44 = vpop.f32.mrb[2].mxu1 }
 0x56b   :  { %3290 = vadd.xlane.f32.xlu1 %v3289_v43  ;;  %v3282_v46 = vpop.f32.mrb[3].mxu1  ;;  %v3293_v47 = vsel %vm79_vm1, %v3280_v44, 0.0 }
 0x56c   :  { %v3294_v48 = vsel %vm79_vm1, %v3282_v46, 0.0 }
 0x56d   :  { %v3295_v49 = vadd.f32 %v3294_v48, %v3293_v47 }
 0x56f   :  { %3296 = vadd.xlane.f32.xlu0 %v3295_v49 }
 0x5f8   :  { %v3291_v2 = vpop.xlane.xlu1 %3290 }
 0x5fc   :  { %v3297_v51 = vpop.xlane.xlu0 %3296 }
 0x5fd   :  { %v3298_v53 = vadd.f32 %v3297_v51, %v3291_v2 }
 0x5ff   :  { %v3299_v45 = vmul.f32 0.001953125, %v3298_v53 }
 0x601   :  { %v3310_v52 = vsub.f32 %v3280_v44, %v3299_v45  ;;  %v3311_v35 = vsub.f32 %v3282_v46, %v3299_v45  ;;  %v3300_v40 = vsub.f32 %v2509_v58, %v3299_v45  ;;  %v3301_v54 = vsub.f32 %v2511_v37, %v3299_v45 }
 0x603   :  { %v3312_v55 = vmul.f32 %v3310_v52, %v3310_v52  ;;  %v3313_v56 = vmul.f32 %v3311_v35, %v3311_v35  ;;  %v3302_v36 = vmul.f32 %v3300_v40, %v3300_v40  ;;  %v3303_v24 = vmul.f32 %v3301_v54, %v3301_v54 }
 0x605   :  { %v3314_v57 = vsel %vm79_vm1, %v3312_v55, 0.0  ;;  %v3315_v59 = vsel %vm79_vm1, %v3313_v56, 0.0  ;;  %v3304_v61 = vsel %vm79_vm1, %v3302_v36, 0.0  ;;  %v3305_v62 = vsel %vm79_vm1, %v3303_v24, 0.0 }
 0x606   :  { %v3316_v63 = vadd.f32 %v3315_v59, %v3314_v57  ;;  %v3306_v12 = vadd.f32 %v3305_v62, %v3304_v61 }
 0x608   :  { %3317 = vadd.xlane.f32.xlu1 %v3316_v63  ;;  %3307 = vadd.xlane.f32.xlu0 %v3306_v12 }
 0x695   :  { %v3318_v60 = vpop.xlane.xlu1 %3317  ;;  %v3308_v7 = vpop.xlane.xlu0 %3307 }
 0x696   :  { %v3319_v11 = vadd.f32 %v3318_v60, %v3308_v7 }
 0x698   :  { %v3320_v8 = vmul.f32 0.001953125, %v3319_v11 }
 0x69a   :  { %v3321_v9 = vadd.f32 1e-05, %v3320_v8 }
 0x69c   :  { %3574 = vrsqrt.f32 %v3321_v9 }
 0x6a6   :  { %v3575_v16 = vpop.eup %3574 }
 0x6a7   :  { %v3323_v17 = vmul.f32 %v3575_v16, %v3992_v15 }
 0x6a9   :  { %3332 = vperm.xlu1 %3559, %v3323_v17   ;;  %v3324_v18 = vmul.f32 %v3323_v17, %v3299_v45 }
 0x6ab   :  { %3326 = vrot.lane.b32.xlu0 %v3324_v18, %s3582_s22 }
 0x6ad   :  { %3560 = vset.pattern.permute.xlu1 %v3590_v13 }
 0x71d   :  { %v3327_v20 = vpop.permute.xlu0 %3326 }
 0x71e   :  { %v3329_v25 = vsub.f32 %v3992_v15, %v3327_v20  ;;  %v3577_v15 = vld [vmem:[%s4291_s0 + $0x8] sm:$0xff] }
 0x720   :  { %3339 = vperm.xlu1 %3560, %v3329_v25  }
 0x728   :  { %v3333_v21 = vpop.permute.xlu1 %3332 }
 0x729   :  { %v3335_v19 = vmul.f32 %v3333_v21, %v2509_v58  ;;  %v3336_v22 = vmul.f32 %v3333_v21, %v2511_v37  ;;  %v3344_v1 = vmul.f32 %v3333_v21, %v3280_v44  ;;  %v3345_v23 = vmul.f32 %v3333_v21, %v3282_v46 }
 0x79f   :  { %v3340_v10 = vpop.permute.xlu1 %3339 }
 0x7a0   :  { %v3342_v14 = vadd.f32 %v3340_v10, %v3335_v19  ;;  %v3343_v28 = vadd.f32 %v3340_v10, %v3336_v22  ;;  %v3346_v29 = vadd.f32 %v3344_v1, %v3340_v10  ;;  %v3347_v31 = vadd.f32 %v3345_v23, %v3340_v10 }
 0x7a2   :  { %v3348_v34 = vadd.f32 %v3576_v32, %v3342_v14  ;;  %v3349_v41 = vadd.f32 %v3343_v28, %v3638_v4  ;;  %v3357_v38 = vadd.f32 %v3577_v15, %v3346_v29  ;;  %v3358_v33 = vadd.f32 %v3347_v31, %v3634_v3 }
 0x7a4   :  { %v3350_v39 = vmax.f32 %v3348_v34, 0.0  ;;  %v3351_v0 = vmax.f32 %v3349_v41, 0.0  ;;  %v3359_v26 = vmax.f32 %v3357_v38, 0.0  ;;  %v3360_v27 = vmax.f32 %v3358_v33, 0.0 }
 0x7a6   :  { %v3354_v30 = vcombine.low %v3350_v39, %v3351_v0  ;;  %v3363_v6 = vcombine.low %v3359_v26, %v3360_v27 }
 0x7a8   :  { %3356 = vst [vmem:[%s4295_s4] sm:$0xff] %v3354_v30  ;;  %3479 = vst [vmem:[%s4295_s4 + $0x8] sm:$0xff] %v3363_v6 }

</bundles_post_ra>
